<compile_context>
chip_gen: v7x
topology: tpu7x:2x2x1
jax: 0.10.0
libtpu: 0.0.40
codegen_flags: <defaults>
</compile_context>

<pallas_src>
import functools
import math

import jax
import jax.numpy as jnp
from jax import lax
from jax.experimental import pallas as pl
from jax.experimental.pallas import tpu as pltpu


# ------------------------------- Pallas kernel -------------------------------
def _gnn_kernel(a_ref, h_ref, w_cat_ref, b_cat_ref, w_gi_ref, b_gi_ref, out_ref,
                *, num_steps):
    """`num_steps` fused SR-GNN gated-graph cells on a block of BB sessions."""
    BB, S, Hp = h_ref.shape                      # Hp is a multiple of 128 lanes
    BS = BB * S
    mxu_dt = w_cat_ref.dtype                     # bf16 (or f32 if disabled)

    a = a_ref[...].astype(jnp.float32)           # (BB, S, 2S): [A_in | A_out]

    # Packed weights (built once on the host, gate boundaries at Hp multiples):
    #   w_cat : (Hp, 5Hp)    = [w_hh^T | w_edge_in^T | w_edge_out^T]
    #   b_cat : (1, 5Hp)     = [b_hh   | b_edge_in   | b_edge_out  ]
    #   w_gi  : (2, Hp, 3Hp) = [w_ih^T[:H], w_ih^T[H:]]  (zero-padded)
    #   b_gi  : (1, 3Hp)     = b_ih + b_iah @ w_ih^T[:H] + b_oah @ w_ih^T[H:]
    w_cat = w_cat_ref[...]
    w_gi_in = w_gi_ref[0]
    w_gi_out = w_gi_ref[1]

    # Hoist the bias broadcasts out of the unrolled step loop (no CSE in JAX).
    b_cat = jnp.broadcast_to(b_cat_ref[...], (BS, 5 * Hp)).astype(jnp.float32)
    b_gi = jnp.broadcast_to(b_gi_ref[...], (BS, 3 * Hp)).astype(jnp.float32)

    use_vpu_mp = S <= 16     # tiny per-session matmuls underfill the MXU

    def message_pass(edge_in, edge_out):
        # edge_in/out: (BB, S, Hp) f32 -> (ai, ao): (BB, S, Hp) f32
        if use_vpu_mp:
            # Unrolled VPU multiply-accumulate over the (small) graph dim j.
            ai = jnp.zeros((BB, S, Hp), jnp.float32)
            ao = jnp.zeros((BB, S, Hp), jnp.float32)
            for j in range(S):                                  # static unroll
                ai = ai + a[:, :, j:j + 1] * edge_in[:, j:j + 1, :]
                ao = ao + a[:, :, S + j:S + j + 1] * edge_out[:, j:j + 1, :]
            return ai, ao
        # Large S: batched MXU matmuls (lane-aligned when S % 128 == 0).
        a_in = a[:, :, :S].astype(mxu_dt)
        a_out = a[:, :, S:].astype(mxu_dt)
        ai = jnp.einsum('bij,bjh->bih', a_in, edge_in.astype(mxu_dt),
                        preferred_element_type=jnp.float32)
        ao = jnp.einsum('bij,bjh->bih', a_out, edge_out.astype(mxu_dt),
                        preferred_element_type=jnp.float32)
        return ai, ao

    def cell(h2):                                   # h2: (BS, Hp) f32
        # One (BS,Hp)@(Hp,5Hp) MXU push replaces the 3 matmuls sharing LHS h.
        big = jnp.dot(h2.astype(mxu_dt), w_cat,
                      preferred_element_type=jnp.float32) + b_cat
        gh = big[:, :3 * Hp]                                        # (BS, 3Hp)
        edge_in = big[:, 3 * Hp:4 * Hp].reshape(BB, S, Hp)
        edge_out = big[:, 4 * Hp:].reshape(BB, S, Hp)

        ai, ao = message_pass(edge_in, edge_out)

        # gi = [input_in | input_out] @ w_ih^T + b_ih, without the concat
        # (b_iah / b_oah already folded into b_gi on the host).
        gi = (jnp.dot(ai.reshape(BS, Hp).astype(mxu_dt), w_gi_in,
                      preferred_element_type=jnp.float32)
              + jnp.dot(ao.reshape(BS, Hp).astype(mxu_dt), w_gi_out,
                        preferred_element_type=jnp.float32)
              + b_gi)                                               # (BS, 3Hp)

        i_r, i_i, i_n = gi[:, :Hp], gi[:, Hp:2 * Hp], gi[:, 2 * Hp:]
        h_r, h_i, h_n = gh[:, :Hp], gh[:, Hp:2 * Hp], gh[:, 2 * Hp:]
        resetgate = jax.nn.sigmoid(i_r + h_r)
        inputgate = jax.nn.sigmoid(i_i + h_i)
        newgate = jnp.tanh(i_n + resetgate * h_n)
        return newgate + inputgate * (h2 - newgate)

    h2 = h_ref[...].astype(jnp.float32).reshape(BS, Hp)
    if num_steps <= 3:
        for _ in range(num_steps):                  # static unroll, small step
            h2 = cell(h2)
    else:
        # Bound the live set for larger step counts, keep LLO visibility.
        h2 = lax.fori_loop(0, num_steps, lambda _, h: cell(h), h2, unroll=True)
    out_ref[...] = h2.reshape(BB, S, Hp).astype(out_ref.dtype)


# ------------------------------- host helpers ---------------------------------
def _tpu_hw_info():
    """(physical VMEM bytes, # TensorCores per chip) with safe fallbacks."""
    phys_vmem = 64 * 1024 * 1024          # conservative default (v7x = 64 MiB)
    n_cores = 1
    try:
        info = pltpu.get_tpu_info()
        v = int(getattr(info, 'vmem_capacity_bytes', 0))
        if v > 0:
            phys_vmem = v
        for attr in ('num_tensorcores', 'tensorcores_per_chip', 'num_cores'):
            c = getattr(info, attr, None)
            if c is not None and int(c) > 0:
                n_cores = int(c)
                break
    except Exception:
        pass
    try:
        kind = jax.devices()[0].device_kind.lower()
        if 'v7' in kind:                  # v7x: 2 TensorCores per chip
            n_cores = max(n_cores, 2)
    except Exception:
        pass
    return phys_vmem, n_cores


def _choose_batch_block(B, S, Hp, vmem_budget_bytes, num_tensorcores):
    """Target ~1024 rows of (bb*S) per grid step, capped by the VMEM budget."""
    target_rows = 1024
    bb = max(1, target_rows // max(S, 1))

    def footprint(bb_):
        rows = bb_ * S
        in_bytes = 4 * bb_ * S * (2 * S) * 2 + 4 * rows * Hp * 2   # dbl-buffered in
        out_bytes = 4 * rows * Hp * 2                              # dbl-buffered out
        interm = 4 * rows * (5 * Hp + 3 * Hp + 3 * Hp + 3 * Hp)    # per-step live
        return in_bytes + out_bytes + interm

    while bb > 1 and footprint(bb) > vmem_budget_bytes:
        bb //= 2
    if S < 128:                            # v5e-friendly: bb*S near 128-row MXU tiles
        gran = max(1, 128 // S)
        if bb > gran:
            bb = (bb // gran) * gran
    bb = min(bb, B)
    if num_tensorcores >= 2 and B >= 2:    # only split for chips with 2 TCs (v7x)
        bb = min(bb, pl.cdiv(B, num_tensorcores))
    return max(1, bb)


def _pad_cols_per_gate(w, H, Hp, n_gates):
    """(rows, n_gates*H) -> (rows, n_gates*Hp): each gate's columns zero-padded."""
    if Hp == H:
        return w
    parts = [jnp.pad(w[:, g * H:(g + 1) * H], ((0, 0), (0, Hp - H)))
             for g in range(n_gates)]
    return jnp.concatenate(parts, axis=1)


def _pad_rows(w, H, Hp):
    if Hp == H:
        return w
    return jnp.pad(w, ((0, Hp - H), (0, 0)))


def pack_session_graph_params(p, mxu_dtype=jnp.bfloat16):
    """One-shot host-side weight fusion / transposition / 128-lane padding."""
    H = p['w_edge_in'].shape[0]
    Hp = pl.cdiv(H, 128) * 128

    w_ih_t = p['w_ih'].T                                        # (2H, 3H)
    w_gi_in = _pad_rows(_pad_cols_per_gate(w_ih_t[:H], H, Hp, 3), H, Hp)   # (Hp,3Hp)
    w_gi_out = _pad_rows(_pad_cols_per_gate(w_ih_t[H:], H, Hp, 3), H, Hp)  # (Hp,3Hp)

    w_hh_t = _pad_rows(_pad_cols_per_gate(p['w_hh'].T, H, Hp, 3), H, Hp)   # (Hp,3Hp)
    w_ein_t = _pad_rows(_pad_cols_per_gate(p['w_edge_in'].T, H, Hp, 1), H, Hp)
    w_eout_t = _pad_rows(_pad_cols_per_gate(p['w_edge_out'].T, H, Hp, 1), H, Hp)
    w_cat = jnp.concatenate([w_hh_t, w_ein_t, w_eout_t], axis=1)           # (Hp,5Hp)

    b_cat = jnp.concatenate([_pad_cols_per_gate(p['b_hh'], H, Hp, 3),
                             _pad_cols_per_gate(p['b_edge_in'], H, Hp, 1),
                             _pad_cols_per_gate(p['b_edge_out'], H, Hp, 1)],
                            axis=1)                                        # (1, 5Hp)

    b_iah = _pad_cols_per_gate(p['b_iah'], H, Hp, 1)
    b_oah = _pad_cols_per_gate(p['b_oah'], H, Hp, 1)
    b_ih = _pad_cols_per_gate(p['b_ih'], H, Hp, 3)
    b_gi = b_ih + b_iah @ w_gi_in + b_oah @ w_gi_out                       # (1, 3Hp)

    emb_p = p['emb'] if Hp == H else jnp.pad(p['emb'], ((0, 0), (0, Hp - H)))

    return {
        'Hp': Hp,
        'emb': emb_p,                                       # lane-dense gather source
        'w_cat': w_cat.astype(mxu_dtype),
        'b_cat': b_cat.astype(jnp.float32),
        'w_gi': jnp.stack([w_gi_in, w_gi_out], 0).astype(mxu_dtype),
        'b_gi': b_gi.astype(jnp.float32),
    }


def gnn_pallas(A, hidden_p, packed, step=1):
    """All `step` GNN cells fused into one pallas_call over batch blocks."""
    B, S, Hp = hidden_p.shape
    w_cat, b_cat, w_gi, b_gi = (packed['w_cat'], packed['b_cat'],
                                packed['w_gi'], packed['b_gi'])

    phys_vmem, n_cores = _tpu_hw_info()
    vmem_limit = int(phys_vmem * 0.75)             # explicit scoped-VMEM limit
    bb = _choose_batch_block(B, S, Hp, int(vmem_limit * 0.8), n_cores)
    nblk = pl.cdiv(B, bb)                          # ragged tail -> masked last block

    kernel = functools.partial(_gnn_kernel, num_steps=step)

    def wspec(shape):
        return pl.BlockSpec(shape, lambda b: (0,) * len(shape))

    out = pl.pallas_call(
        kernel,
        out_shape=jax.ShapeDtypeStruct((B, S, Hp), hidden_p.dtype),
        grid=(nblk,),
        in_specs=[
            pl.BlockSpec((bb, S, 2 * S), lambda b: (b, 0, 0)),  # A (in|out halves)
            pl.BlockSpec((bb, S, Hp), lambda b: (b, 0, 0)),     # hidden block
            wspec(w_cat.shape),                                 # w_cat  (Hp, 5Hp)
            wspec(b_cat.shape),                                 # b_cat  (1, 5Hp)
            wspec(w_gi.shape),                                  # w_gi   (2, Hp, 3Hp)
            wspec(b_gi.shape),                                  # b_gi   (1, 3Hp)
        ],
        out_specs=pl.BlockSpec((bb, S, Hp), lambda b: (b, 0, 0)),
        compiler_params=pltpu.CompilerParams(
            dimension_semantics=("parallel",),
            vmem_limit_bytes=vmem_limit),
    )(A, hidden_p, w_cat, b_cat, w_gi, b_gi)
    return out


def session_graph_forward(params, inputs, A, alias_inputs, targets, mask, step=1,
                          mxu_dtype=jnp.bfloat16):
    """SessionGraph.forward -> (hidden, g_hidden, A, inputs).
    alias_inputs / targets / mask are carried for API parity but unused in the
    forward pass, exactly as in the PyTorch module."""
    del alias_inputs, targets, mask
    H = params['w_edge_in'].shape[0]
    packed = pack_session_graph_params(params, mxu_dtype=mxu_dtype)
    hidden_p = jnp.take(packed['emb'], inputs, axis=0)   # (B, S, Hp) lane-dense gather
    g_hidden_p = gnn_pallas(A, hidden_p, packed, step=step)
    hidden = hidden_p[..., :H]                           # original-width outputs
    g_hidden = g_hidden_p[..., :H]
    return hidden, g_hidden, A, inputs


# ----------------------------- pure-JAX reference -----------------------------
def gnn_cell_ref(A, hidden, p):
    B, S, H = hidden.shape
    a_in = A[:, :, :S]
    a_out = A[:, :, S:2 * S]
    edge_in = hidden @ p['w_edge_in'].T + p['b_edge_in']
    edge_out = hidden @ p['w_edge_out'].T + p['b_edge_out']
    input_in = jnp.einsum('bij,bjh->bih', a_in, edge_in) + p['b_iah']
    input_out = jnp.einsum('bij,bjh->bih', a_out, edge_out) + p['b_oah']
    gru_in = jnp.concatenate([input_in, input_out], axis=-1)
    gi = gru_in @ p['w_ih'].T + p['b_ih']
    gh = hidden @ p['w_hh'].T + p['b_hh']
    i_r, i_i, i_n = gi[..., :H], gi[..., H:2 * H], gi[..., 2 * H:]
    h_r, h_i, h_n = gh[..., :H], gh[..., H:2 * H], gh[..., 2 * H:]
    rg = jax.nn.sigmoid(i_r + h_r)
    ig = jax.nn.sigmoid(i_i + h_i)
    ng = jnp.tanh(i_n + rg * h_n)
    return ng + ig * (hidden - ng)


def init_params(key, n_node, H):
    # SessionGraph.reset_parameters: uniform(-1/sqrt(H), 1/sqrt(H)) for every weight.
    stdv = 1.0 / math.sqrt(H)
    ks = jax.random.split(key, 11)
    u = lambda k, shape: jax.random.uniform(k, shape, jnp.float32, -stdv, stdv)
    return {
        'emb':        u(ks[0], (n_node, H)),      # nn.Embedding(n_node, H)
        'w_edge_in':  u(ks[1], (H, H)),           # linear_edge_in
        'b_edge_in':  u(ks[2], (1, H)),
        'w_edge_out': u(ks[3], (H, H)),           # linear_edge_out
        'b_edge_out': u(ks[4], (1, H)),
        'b_iah':      u(ks[5], (1, H)),
        'b_oah':      u(ks[6], (1, H)),
        'w_ih':       u(ks[7], (3 * H, 2 * H)),   # gate_size x input_size
        'b_ih':       u(ks[8], (1, 3 * H)),
        'w_hh':       u(ks[9], (3 * H, H)),       # gate_size x hidden_size
        'b_hh':       u(ks[10], (1, 3 * H)),
    }


if __name__ == "__main__":
    B, S, H, n_node, step = 2, 8, 32, 50, 2

    key = jax.random.PRNGKey(0)
    kp, ki, ka = jax.random.split(key, 3)
    params = init_params(kp, n_node, H)

    inputs = jax.random.randint(ki, (B, S), 0, n_node, dtype=jnp.int32)
    A = jax.random.uniform(ka, (B, S, 2 * S), jnp.float32)   # normalized adjacency stand-in
    alias_inputs = jnp.tile(jnp.arange(S, dtype=jnp.int32), (B, 1))
    targets = jnp.zeros((B,), jnp.int32)
    mask = jnp.ones((B, S), jnp.float32)

    fwd = jax.jit(session_graph_forward, static_argnames=('step', 'mxu_dtype'))
    hidden, g_hidden, A_out, inputs_out = fwd(
        params, inputs, A, alias_inputs, targets, mask, step=step)
    jax.block_until_ready(g_hidden)

    # check against pure-JAX f32 reference (the unfused PyTorch-form math)
    ref_h = jnp.take(params['emb'], inputs, axis=0)
    ref = ref_h
    for _ in range(step):
        ref = gnn_cell_ref(A, ref, params)

    assert hidden.shape == (B, S, H) and g_hidden.shape == (B, S, H)
    assert g_hidden.dtype == hidden.dtype
    assert jnp.allclose(hidden, ref_h, atol=1e-6, rtol=1e-6), "embedding mismatch"
    # bf16 MXU operands -> loosened tolerance vs the f32 reference.
    err = float(jnp.max(jnp.abs(g_hidden - ref)))
    assert jnp.allclose(g_hidden, ref, atol=5e-2, rtol=5e-2), f"mismatch, max|d|={err}"

    print("KERNEL_OK")
</pallas_src>

<mosaic_0001>
module attributes {stable_mosaic.version = 11 : i64} {
  func.func @_gnn_kernel(%arg0: i32, %arg1: memref<2x8x16xf32, #tpu.memory_space<vmem>>, %arg2: memref<2x8x128xf32, #tpu.memory_space<vmem>>, %arg3: memref<128x640xbf16, #tpu.memory_space<vmem>>, %arg4: memref<1x640xf32, #tpu.memory_space<vmem>>, %arg5: memref<2x128x384xbf16, #tpu.memory_space<vmem>>, %arg6: memref<1x384xf32, #tpu.memory_space<vmem>>, %arg7: memref<2x8x128xf32, #tpu.memory_space<vmem>>) attributes {dimension_semantics = [#tpu.dimension_semantics<parallel>], iteration_bounds = array<i64: 1>, scalar_prefetch = 0 : i64, scratch_operands = 0 : i64, tpu.core_type = #tpu.core_type<tc>, window_params = [{transform_indices = @transform_0, window_bounds = array<i64: 2, 8, 16>}, {transform_indices = @transform_1, window_bounds = array<i64: 2, 8, 128>}, {pipeline_mode = #tpu.pipeline_mode<synchronous>, transform_indices = @transform_2, window_bounds = array<i64: 128, 640>}, {pipeline_mode = #tpu.pipeline_mode<synchronous>, transform_indices = @transform_3, window_bounds = array<i64: 1, 640>}, {pipeline_mode = #tpu.pipeline_mode<synchronous>, transform_indices = @transform_4, window_bounds = array<i64: 2, 128, 384>}, {pipeline_mode = #tpu.pipeline_mode<synchronous>, transform_indices = @transform_5, window_bounds = array<i64: 1, 384>}, {transform_indices = @transform_6, window_bounds = array<i64: 2, 8, 128>}]} {
    %c0 = arith.constant 0 : index
    %c0_0 = arith.constant 0 : index
    %c0_1 = arith.constant 0 : index
    %0 = vector.load %arg1[%c0, %c0_0, %c0_1] : memref<2x8x16xf32, #tpu.memory_space<vmem>>, vector<2x8x16xf32>
    %c0_2 = arith.constant 0 : index
    %c0_3 = arith.constant 0 : index
    %1 = vector.load %arg3[%c0_2, %c0_3] : memref<128x640xbf16, #tpu.memory_space<vmem>>, vector<128x640xbf16>
    %c0_4 = arith.constant 0 : index
    %c0_5 = arith.constant 0 : index
    %c0_6 = arith.constant 0 : index
    %2 = vector.load %arg5[%c0_4, %c0_5, %c0_6] : memref<2x128x384xbf16, #tpu.memory_space<vmem>>, vector<1x128x384xbf16>
    %3 = vector.shape_cast %2 : vector<1x128x384xbf16> to vector<128x384xbf16>
    %c1 = arith.constant 1 : index
    %c0_7 = arith.constant 0 : index
    %c0_8 = arith.constant 0 : index
    %4 = vector.load %arg5[%c1, %c0_7, %c0_8] : memref<2x128x384xbf16, #tpu.memory_space<vmem>>, vector<1x128x384xbf16>
    %5 = vector.shape_cast %4 : vector<1x128x384xbf16> to vector<128x384xbf16>
    %c0_9 = arith.constant 0 : index
    %c0_10 = arith.constant 0 : index
    %6 = vector.load %arg4[%c0_9, %c0_10] : memref<1x640xf32, #tpu.memory_space<vmem>>, vector<1x640xf32>
    %7 = vector.shape_cast %6 : vector<1x640xf32> to vector<1x640xf32>
    %8 = vector.broadcast %7 : vector<1x640xf32> to vector<16x640xf32>
    %c0_11 = arith.constant 0 : index
    %c0_12 = arith.constant 0 : index
    %9 = vector.load %arg6[%c0_11, %c0_12] : memref<1x384xf32, #tpu.memory_space<vmem>>, vector<1x384xf32>
    %10 = vector.shape_cast %9 : vector<1x384xf32> to vector<1x384xf32>
    %11 = vector.broadcast %10 : vector<1x384xf32> to vector<16x384xf32>
    %c0_13 = arith.constant 0 : index
    %c0_14 = arith.constant 0 : index
    %c0_15 = arith.constant 0 : index
    %12 = vector.load %arg2[%c0_13, %c0_14, %c0_15] : memref<2x8x128xf32, #tpu.memory_space<vmem>>, vector<2x8x128xf32>
    %13 = vector.shape_cast %12 : vector<2x8x128xf32> to vector<16x128xf32>
    %14 = arith.truncf %13 : vector<16x128xf32> to vector<16x128xbf16>
    %cst = arith.constant dense<0.000000e+00> : vector<16x640xf32>
    %15 = tpu.matmul %14, %1, %cst {dimension_numbers = #tpu.dot_dimension_numbers<[1], [0], [0], [1], [0, 0, 1, 1], [], []>} : vector<16x128xbf16>, vector<128x640xbf16>, vector<16x640xf32> -> vector<16x640xf32>
    %16 = arith.addf %15, %8 : vector<16x640xf32>
    %17 = vector.extract_strided_slice %16 {offsets = [0, 0], sizes = [16, 384], strides = [1, 1]} : vector<16x640xf32> to vector<16x384xf32>
    %18 = vector.extract_strided_slice %16 {offsets = [0, 384], sizes = [16, 128], strides = [1, 1]} : vector<16x640xf32> to vector<16x128xf32>
    %19 = vector.shape_cast %18 : vector<16x128xf32> to vector<2x8x128xf32>
    %20 = vector.extract_strided_slice %16 {offsets = [0, 512], sizes = [16, 128], strides = [1, 1]} : vector<16x640xf32> to vector<16x128xf32>
    %21 = vector.shape_cast %20 : vector<16x128xf32> to vector<2x8x128xf32>
    %cst_16 = arith.constant 0.000000e+00 : f32
    %22 = vector.broadcast %cst_16 : f32 to vector<2x8x128xf32>
    %cst_17 = arith.constant 0.000000e+00 : f32
    %23 = vector.broadcast %cst_17 : f32 to vector<2x8x128xf32>
    %24 = vector.extract_strided_slice %0 {offsets = [0, 0, 0], sizes = [2, 8, 1], strides = [1, 1, 1]} : vector<2x8x16xf32> to vector<2x8x1xf32>
    %25 = vector.extract_strided_slice %19 {offsets = [0, 0, 0], sizes = [2, 1, 128], strides = [1, 1, 1]} : vector<2x8x128xf32> to vector<2x1x128xf32>
    %26 = vector.broadcast %24 : vector<2x8x1xf32> to vector<2x8x128xf32>
    %27 = vector.broadcast %25 : vector<2x1x128xf32> to vector<2x8x128xf32>
    %28 = arith.mulf %26, %27 : vector<2x8x128xf32>
    %29 = arith.addf %22, %28 : vector<2x8x128xf32>
    %30 = vector.extract_strided_slice %0 {offsets = [0, 0, 8], sizes = [2, 8, 1], strides = [1, 1, 1]} : vector<2x8x16xf32> to vector<2x8x1xf32>
    %31 = vector.extract_strided_slice %21 {offsets = [0, 0, 0], sizes = [2, 1, 128], strides = [1, 1, 1]} : vector<2x8x128xf32> to vector<2x1x128xf32>
    %32 = vector.broadcast %30 : vector<2x8x1xf32> to vector<2x8x128xf32>
    %33 = vector.broadcast %31 : vector<2x1x128xf32> to vector<2x8x128xf32>
    %34 = arith.mulf %32, %33 : vector<2x8x128xf32>
    %35 = arith.addf %23, %34 : vector<2x8x128xf32>
    %36 = vector.extract_strided_slice %0 {offsets = [0, 0, 1], sizes = [2, 8, 1], strides = [1, 1, 1]} : vector<2x8x16xf32> to vector<2x8x1xf32>
    %37 = vector.extract_strided_slice %19 {offsets = [0, 1, 0], sizes = [2, 1, 128], strides = [1, 1, 1]} : vector<2x8x128xf32> to vector<2x1x128xf32>
    %38 = vector.broadcast %36 : vector<2x8x1xf32> to vector<2x8x128xf32>
    %39 = vector.broadcast %37 : vector<2x1x128xf32> to vector<2x8x128xf32>
    %40 = arith.mulf %38, %39 : vector<2x8x128xf32>
    %41 = arith.addf %29, %40 : vector<2x8x128xf32>
    %42 = vector.extract_strided_slice %0 {offsets = [0, 0, 9], sizes = [2, 8, 1], strides = [1, 1, 1]} : vector<2x8x16xf32> to vector<2x8x1xf32>
    %43 = vector.extract_strided_slice %21 {offsets = [0, 1, 0], sizes = [2, 1, 128], strides = [1, 1, 1]} : vector<2x8x128xf32> to vector<2x1x128xf32>
    %44 = vector.broadcast %42 : vector<2x8x1xf32> to vector<2x8x128xf32>
    %45 = vector.broadcast %43 : vector<2x1x128xf32> to vector<2x8x128xf32>
    %46 = arith.mulf %44, %45 : vector<2x8x128xf32>
    %47 = arith.addf %35, %46 : vector<2x8x128xf32>
    %48 = vector.extract_strided_slice %0 {offsets = [0, 0, 2], sizes = [2, 8, 1], strides = [1, 1, 1]} : vector<2x8x16xf32> to vector<2x8x1xf32>
    %49 = vector.extract_strided_slice %19 {offsets = [0, 2, 0], sizes = [2, 1, 128], strides = [1, 1, 1]} : vector<2x8x128xf32> to vector<2x1x128xf32>
    %50 = vector.broadcast %48 : vector<2x8x1xf32> to vector<2x8x128xf32>
    %51 = vector.broadcast %49 : vector<2x1x128xf32> to vector<2x8x128xf32>
    %52 = arith.mulf %50, %51 : vector<2x8x128xf32>
    %53 = arith.addf %41, %52 : vector<2x8x128xf32>
    %54 = vector.extract_strided_slice %0 {offsets = [0, 0, 10], sizes = [2, 8, 1], strides = [1, 1, 1]} : vector<2x8x16xf32> to vector<2x8x1xf32>
    %55 = vector.extract_strided_slice %21 {offsets = [0, 2, 0], sizes = [2, 1, 128], strides = [1, 1, 1]} : vector<2x8x128xf32> to vector<2x1x128xf32>
    %56 = vector.broadcast %54 : vector<2x8x1xf32> to vector<2x8x128xf32>
    %57 = vector.broadcast %55 : vector<2x1x128xf32> to vector<2x8x128xf32>
    %58 = arith.mulf %56, %57 : vector<2x8x128xf32>
    %59 = arith.addf %47, %58 : vector<2x8x128xf32>
    %60 = vector.extract_strided_slice %0 {offsets = [0, 0, 3], sizes = [2, 8, 1], strides = [1, 1, 1]} : vector<2x8x16xf32> to vector<2x8x1xf32>
    %61 = vector.extract_strided_slice %19 {offsets = [0, 3, 0], sizes = [2, 1, 128], strides = [1, 1, 1]} : vector<2x8x128xf32> to vector<2x1x128xf32>
    %62 = vector.broadcast %60 : vector<2x8x1xf32> to vector<2x8x128xf32>
    %63 = vector.broadcast %61 : vector<2x1x128xf32> to vector<2x8x128xf32>
    %64 = arith.mulf %62, %63 : vector<2x8x128xf32>
    %65 = arith.addf %53, %64 : vector<2x8x128xf32>
    %66 = vector.extract_strided_slice %0 {offsets = [0, 0, 11], sizes = [2, 8, 1], strides = [1, 1, 1]} : vector<2x8x16xf32> to vector<2x8x1xf32>
    %67 = vector.extract_strided_slice %21 {offsets = [0, 3, 0], sizes = [2, 1, 128], strides = [1, 1, 1]} : vector<2x8x128xf32> to vector<2x1x128xf32>
    %68 = vector.broadcast %66 : vector<2x8x1xf32> to vector<2x8x128xf32>
    %69 = vector.broadcast %67 : vector<2x1x128xf32> to vector<2x8x128xf32>
    %70 = arith.mulf %68, %69 : vector<2x8x128xf32>
    %71 = arith.addf %59, %70 : vector<2x8x128xf32>
    %72 = vector.extract_strided_slice %0 {offsets = [0, 0, 4], sizes = [2, 8, 1], strides = [1, 1, 1]} : vector<2x8x16xf32> to vector<2x8x1xf32>
    %73 = vector.extract_strided_slice %19 {offsets = [0, 4, 0], sizes = [2, 1, 128], strides = [1, 1, 1]} : vector<2x8x128xf32> to vector<2x1x128xf32>
    %74 = vector.broadcast %72 : vector<2x8x1xf32> to vector<2x8x128xf32>
    %75 = vector.broadcast %73 : vector<2x1x128xf32> to vector<2x8x128xf32>
    %76 = arith.mulf %74, %75 : vector<2x8x128xf32>
    %77 = arith.addf %65, %76 : vector<2x8x128xf32>
    %78 = vector.extract_strided_slice %0 {offsets = [0, 0, 12], sizes = [2, 8, 1], strides = [1, 1, 1]} : vector<2x8x16xf32> to vector<2x8x1xf32>
    %79 = vector.extract_strided_slice %21 {offsets = [0, 4, 0], sizes = [2, 1, 128], strides = [1, 1, 1]} : vector<2x8x128xf32> to vector<2x1x128xf32>
    %80 = vector.broadcast %78 : vector<2x8x1xf32> to vector<2x8x128xf32>
    %81 = vector.broadcast %79 : vector<2x1x128xf32> to vector<2x8x128xf32>
    %82 = arith.mulf %80, %81 : vector<2x8x128xf32>
    %83 = arith.addf %71, %82 : vector<2x8x128xf32>
    %84 = vector.extract_strided_slice %0 {offsets = [0, 0, 5], sizes = [2, 8, 1], strides = [1, 1, 1]} : vector<2x8x16xf32> to vector<2x8x1xf32>
    %85 = vector.extract_strided_slice %19 {offsets = [0, 5, 0], sizes = [2, 1, 128], strides = [1, 1, 1]} : vector<2x8x128xf32> to vector<2x1x128xf32>
    %86 = vector.broadcast %84 : vector<2x8x1xf32> to vector<2x8x128xf32>
    %87 = vector.broadcast %85 : vector<2x1x128xf32> to vector<2x8x128xf32>
    %88 = arith.mulf %86, %87 : vector<2x8x128xf32>
    %89 = arith.addf %77, %88 : vector<2x8x128xf32>
    %90 = vector.extract_strided_slice %0 {offsets = [0, 0, 13], sizes = [2, 8, 1], strides = [1, 1, 1]} : vector<2x8x16xf32> to vector<2x8x1xf32>
    %91 = vector.extract_strided_slice %21 {offsets = [0, 5, 0], sizes = [2, 1, 128], strides = [1, 1, 1]} : vector<2x8x128xf32> to vector<2x1x128xf32>
    %92 = vector.broadcast %90 : vector<2x8x1xf32> to vector<2x8x128xf32>
    %93 = vector.broadcast %91 : vector<2x1x128xf32> to vector<2x8x128xf32>
    %94 = arith.mulf %92, %93 : vector<2x8x128xf32>
    %95 = arith.addf %83, %94 : vector<2x8x128xf32>
    %96 = vector.extract_strided_slice %0 {offsets = [0, 0, 6], sizes = [2, 8, 1], strides = [1, 1, 1]} : vector<2x8x16xf32> to vector<2x8x1xf32>
    %97 = vector.extract_strided_slice %19 {offsets = [0, 6, 0], sizes = [2, 1, 128], strides = [1, 1, 1]} : vector<2x8x128xf32> to vector<2x1x128xf32>
    %98 = vector.broadcast %96 : vector<2x8x1xf32> to vector<2x8x128xf32>
    %99 = vector.broadcast %97 : vector<2x1x128xf32> to vector<2x8x128xf32>
    %100 = arith.mulf %98, %99 : vector<2x8x128xf32>
    %101 = arith.addf %89, %100 : vector<2x8x128xf32>
    %102 = vector.extract_strided_slice %0 {offsets = [0, 0, 14], sizes = [2, 8, 1], strides = [1, 1, 1]} : vector<2x8x16xf32> to vector<2x8x1xf32>
    %103 = vector.extract_strided_slice %21 {offsets = [0, 6, 0], sizes = [2, 1, 128], strides = [1, 1, 1]} : vector<2x8x128xf32> to vector<2x1x128xf32>
    %104 = vector.broadcast %102 : vector<2x8x1xf32> to vector<2x8x128xf32>
    %105 = vector.broadcast %103 : vector<2x1x128xf32> to vector<2x8x128xf32>
    %106 = arith.mulf %104, %105 : vector<2x8x128xf32>
    %107 = arith.addf %95, %106 : vector<2x8x128xf32>
    %108 = vector.extract_strided_slice %0 {offsets = [0, 0, 7], sizes = [2, 8, 1], strides = [1, 1, 1]} : vector<2x8x16xf32> to vector<2x8x1xf32>
    %109 = vector.extract_strided_slice %19 {offsets = [0, 7, 0], sizes = [2, 1, 128], strides = [1, 1, 1]} : vector<2x8x128xf32> to vector<2x1x128xf32>
    %110 = vector.broadcast %108 : vector<2x8x1xf32> to vector<2x8x128xf32>
    %111 = vector.broadcast %109 : vector<2x1x128xf32> to vector<2x8x128xf32>
    %112 = arith.mulf %110, %111 : vector<2x8x128xf32>
    %113 = arith.addf %101, %112 : vector<2x8x128xf32>
    %114 = vector.extract_strided_slice %0 {offsets = [0, 0, 15], sizes = [2, 8, 1], strides = [1, 1, 1]} : vector<2x8x16xf32> to vector<2x8x1xf32>
    %115 = vector.extract_strided_slice %21 {offsets = [0, 7, 0], sizes = [2, 1, 128], strides = [1, 1, 1]} : vector<2x8x128xf32> to vector<2x1x128xf32>
    %116 = vector.broadcast %114 : vector<2x8x1xf32> to vector<2x8x128xf32>
    %117 = vector.broadcast %115 : vector<2x1x128xf32> to vector<2x8x128xf32>
    %118 = arith.mulf %116, %117 : vector<2x8x128xf32>
    %119 = arith.addf %107, %118 : vector<2x8x128xf32>
    %120 = vector.shape_cast %113 : vector<2x8x128xf32> to vector<16x128xf32>
    %121 = arith.truncf %120 : vector<16x128xf32> to vector<16x128xbf16>
    %cst_18 = arith.constant dense<0.000000e+00> : vector<16x384xf32>
    %122 = tpu.matmul %121, %3, %cst_18 {dimension_numbers = #tpu.dot_dimension_numbers<[1], [0], [0], [1], [0, 0, 1, 1], [], []>} : vector<16x128xbf16>, vector<128x384xbf16>, vector<16x384xf32> -> vector<16x384xf32>
    %123 = vector.shape_cast %119 : vector<2x8x128xf32> to vector<16x128xf32>
    %124 = arith.truncf %123 : vector<16x128xf32> to vector<16x128xbf16>
    %cst_19 = arith.constant dense<0.000000e+00> : vector<16x384xf32>
    %125 = tpu.matmul %124, %5, %cst_19 {dimension_numbers = #tpu.dot_dimension_numbers<[1], [0], [0], [1], [0, 0, 1, 1], [], []>} : vector<16x128xbf16>, vector<128x384xbf16>, vector<16x384xf32> -> vector<16x384xf32>
    %126 = arith.addf %122, %125 : vector<16x384xf32>
    %127 = arith.addf %126, %11 : vector<16x384xf32>
    %128 = vector.extract_strided_slice %127 {offsets = [0, 0], sizes = [16, 128], strides = [1, 1]} : vector<16x384xf32> to vector<16x128xf32>
    %129 = vector.extract_strided_slice %127 {offsets = [0, 128], sizes = [16, 128], strides = [1, 1]} : vector<16x384xf32> to vector<16x128xf32>
    %130 = vector.extract_strided_slice %127 {offsets = [0, 256], sizes = [16, 128], strides = [1, 1]} : vector<16x384xf32> to vector<16x128xf32>
    %131 = vector.extract_strided_slice %17 {offsets = [0, 0], sizes = [16, 128], strides = [1, 1]} : vector<16x384xf32> to vector<16x128xf32>
    %132 = vector.extract_strided_slice %17 {offsets = [0, 128], sizes = [16, 128], strides = [1, 1]} : vector<16x384xf32> to vector<16x128xf32>
    %133 = vector.extract_strided_slice %17 {offsets = [0, 256], sizes = [16, 128], strides = [1, 1]} : vector<16x384xf32> to vector<16x128xf32>
    %134 = arith.addf %128, %131 : vector<16x128xf32>
    %135 = arith.negf %134 : vector<16x128xf32>
    %136 = math.exp %135 : vector<16x128xf32>
    %cst_20 = arith.constant 1.000000e+00 : f32
    %137 = vector.broadcast %cst_20 : f32 to vector<16x128xf32>
    %138 = arith.addf %137, %136 : vector<16x128xf32>
    %139 = arith.divf %137, %138 : vector<16x128xf32>
    %140 = arith.addf %129, %132 : vector<16x128xf32>
    %141 = arith.negf %140 : vector<16x128xf32>
    %142 = math.exp %141 : vector<16x128xf32>
    %cst_21 = arith.constant 1.000000e+00 : f32
    %143 = vector.broadcast %cst_21 : f32 to vector<16x128xf32>
    %144 = arith.addf %143, %142 : vector<16x128xf32>
    %145 = arith.divf %143, %144 : vector<16x128xf32>
    %146 = arith.mulf %139, %133 : vector<16x128xf32>
    %147 = arith.addf %130, %146 : vector<16x128xf32>
    %148 = math.tanh %147 : vector<16x128xf32>
    %149 = arith.subf %13, %148 : vector<16x128xf32>
    %150 = arith.mulf %145, %149 : vector<16x128xf32>
    %151 = arith.addf %148, %150 : vector<16x128xf32>
    %152 = arith.truncf %151 : vector<16x128xf32> to vector<16x128xbf16>
    %cst_22 = arith.constant dense<0.000000e+00> : vector<16x640xf32>
    %153 = tpu.matmul %152, %1, %cst_22 {dimension_numbers = #tpu.dot_dimension_numbers<[1], [0], [0], [1], [0, 0, 1, 1], [], []>} : vector<16x128xbf16>, vector<128x640xbf16>, vector<16x640xf32> -> vector<16x640xf32>
    %154 = arith.addf %153, %8 : vector<16x640xf32>
    %155 = vector.extract_strided_slice %154 {offsets = [0, 0], sizes = [16, 384], strides = [1, 1]} : vector<16x640xf32> to vector<16x384xf32>
    %156 = vector.extract_strided_slice %154 {offsets = [0, 384], sizes = [16, 128], strides = [1, 1]} : vector<16x640xf32> to vector<16x128xf32>
    %157 = vector.shape_cast %156 : vector<16x128xf32> to vector<2x8x128xf32>
    %158 = vector.extract_strided_slice %154 {offsets = [0, 512], sizes = [16, 128], strides = [1, 1]} : vector<16x640xf32> to vector<16x128xf32>
    %159 = vector.shape_cast %158 : vector<16x128xf32> to vector<2x8x128xf32>
    %cst_23 = arith.constant 0.000000e+00 : f32
    %160 = vector.broadcast %cst_23 : f32 to vector<2x8x128xf32>
    %cst_24 = arith.constant 0.000000e+00 : f32
    %161 = vector.broadcast %cst_24 : f32 to vector<2x8x128xf32>
    %162 = vector.extract_strided_slice %0 {offsets = [0, 0, 0], sizes = [2, 8, 1], strides = [1, 1, 1]} : vector<2x8x16xf32> to vector<2x8x1xf32>
    %163 = vector.extract_strided_slice %157 {offsets = [0, 0, 0], sizes = [2, 1, 128], strides = [1, 1, 1]} : vector<2x8x128xf32> to vector<2x1x128xf32>
    %164 = vector.broadcast %162 : vector<2x8x1xf32> to vector<2x8x128xf32>
    %165 = vector.broadcast %163 : vector<2x1x128xf32> to vector<2x8x128xf32>
    %166 = arith.mulf %164, %165 : vector<2x8x128xf32>
    %167 = arith.addf %160, %166 : vector<2x8x128xf32>
    %168 = vector.extract_strided_slice %0 {offsets = [0, 0, 8], sizes = [2, 8, 1], strides = [1, 1, 1]} : vector<2x8x16xf32> to vector<2x8x1xf32>
    %169 = vector.extract_strided_slice %159 {offsets = [0, 0, 0], sizes = [2, 1, 128], strides = [1, 1, 1]} : vector<2x8x128xf32> to vector<2x1x128xf32>
    %170 = vector.broadcast %168 : vector<2x8x1xf32> to vector<2x8x128xf32>
    %171 = vector.broadcast %169 : vector<2x1x128xf32> to vector<2x8x128xf32>
    %172 = arith.mulf %170, %171 : vector<2x8x128xf32>
    %173 = arith.addf %161, %172 : vector<2x8x128xf32>
    %174 = vector.extract_strided_slice %0 {offsets = [0, 0, 1], sizes = [2, 8, 1], strides = [1, 1, 1]} : vector<2x8x16xf32> to vector<2x8x1xf32>
    %175 = vector.extract_strided_slice %157 {offsets = [0, 1, 0], sizes = [2, 1, 128], strides = [1, 1, 1]} : vector<2x8x128xf32> to vector<2x1x128xf32>
    %176 = vector.broadcast %174 : vector<2x8x1xf32> to vector<2x8x128xf32>
    %177 = vector.broadcast %175 : vector<2x1x128xf32> to vector<2x8x128xf32>
    %178 = arith.mulf %176, %177 : vector<2x8x128xf32>
    %179 = arith.addf %167, %178 : vector<2x8x128xf32>
    %180 = vector.extract_strided_slice %0 {offsets = [0, 0, 9], sizes = [2, 8, 1], strides = [1, 1, 1]} : vector<2x8x16xf32> to vector<2x8x1xf32>
    %181 = vector.extract_strided_slice %159 {offsets = [0, 1, 0], sizes = [2, 1, 128], strides = [1, 1, 1]} : vector<2x8x128xf32> to vector<2x1x128xf32>
    %182 = vector.broadcast %180 : vector<2x8x1xf32> to vector<2x8x128xf32>
    %183 = vector.broadcast %181 : vector<2x1x128xf32> to vector<2x8x128xf32>
    %184 = arith.mulf %182, %183 : vector<2x8x128xf32>
    %185 = arith.addf %173, %184 : vector<2x8x128xf32>
    %186 = vector.extract_strided_slice %0 {offsets = [0, 0, 2], sizes = [2, 8, 1], strides = [1, 1, 1]} : vector<2x8x16xf32> to vector<2x8x1xf32>
    %187 = vector.extract_strided_slice %157 {offsets = [0, 2, 0], sizes = [2, 1, 128], strides = [1, 1, 1]} : vector<2x8x128xf32> to vector<2x1x128xf32>
    %188 = vector.broadcast %186 : vector<2x8x1xf32> to vector<2x8x128xf32>
    %189 = vector.broadcast %187 : vector<2x1x128xf32> to vector<2x8x128xf32>
    %190 = arith.mulf %188, %189 : vector<2x8x128xf32>
    %191 = arith.addf %179, %190 : vector<2x8x128xf32>
    %192 = vector.extract_strided_slice %0 {offsets = [0, 0, 10], sizes = [2, 8, 1], strides = [1, 1, 1]} : vector<2x8x16xf32> to vector<2x8x1xf32>
    %193 = vector.extract_strided_slice %159 {offsets = [0, 2, 0], sizes = [2, 1, 128], strides = [1, 1, 1]} : vector<2x8x128xf32> to vector<2x1x128xf32>
    %194 = vector.broadcast %192 : vector<2x8x1xf32> to vector<2x8x128xf32>
    %195 = vector.broadcast %193 : vector<2x1x128xf32> to vector<2x8x128xf32>
    %196 = arith.mulf %194, %195 : vector<2x8x128xf32>
    %197 = arith.addf %185, %196 : vector<2x8x128xf32>
    %198 = vector.extract_strided_slice %0 {offsets = [0, 0, 3], sizes = [2, 8, 1], strides = [1, 1, 1]} : vector<2x8x16xf32> to vector<2x8x1xf32>
    %199 = vector.extract_strided_slice %157 {offsets = [0, 3, 0], sizes = [2, 1, 128], strides = [1, 1, 1]} : vector<2x8x128xf32> to vector<2x1x128xf32>
    %200 = vector.broadcast %198 : vector<2x8x1xf32> to vector<2x8x128xf32>
    %201 = vector.broadcast %199 : vector<2x1x128xf32> to vector<2x8x128xf32>
    %202 = arith.mulf %200, %201 : vector<2x8x128xf32>
    %203 = arith.addf %191, %202 : vector<2x8x128xf32>
    %204 = vector.extract_strided_slice %0 {offsets = [0, 0, 11], sizes = [2, 8, 1], strides = [1, 1, 1]} : vector<2x8x16xf32> to vector<2x8x1xf32>
    %205 = vector.extract_strided_slice %159 {offsets = [0, 3, 0], sizes = [2, 1, 128], strides = [1, 1, 1]} : vector<2x8x128xf32> to vector<2x1x128xf32>
    %206 = vector.broadcast %204 : vector<2x8x1xf32> to vector<2x8x128xf32>
    %207 = vector.broadcast %205 : vector<2x1x128xf32> to vector<2x8x128xf32>
    %208 = arith.mulf %206, %207 : vector<2x8x128xf32>
    %209 = arith.addf %197, %208 : vector<2x8x128xf32>
    %210 = vector.extract_strided_slice %0 {offsets = [0, 0, 4], sizes = [2, 8, 1], strides = [1, 1, 1]} : vector<2x8x16xf32> to vector<2x8x1xf32>
    %211 = vector.extract_strided_slice %157 {offsets = [0, 4, 0], sizes = [2, 1, 128], strides = [1, 1, 1]} : vector<2x8x128xf32> to vector<2x1x128xf32>
    %212 = vector.broadcast %210 : vector<2x8x1xf32> to vector<2x8x128xf32>
    %213 = vector.broadcast %211 : vector<2x1x128xf32> to vector<2x8x128xf32>
    %214 = arith.mulf %212, %213 : vector<2x8x128xf32>
    %215 = arith.addf %203, %214 : vector<2x8x128xf32>
    %216 = vector.extract_strided_slice %0 {offsets = [0, 0, 12], sizes = [2, 8, 1], strides = [1, 1, 1]} : vector<2x8x16xf32> to vector<2x8x1xf32>
    %217 = vector.extract_strided_slice %159 {offsets = [0, 4, 0], sizes = [2, 1, 128], strides = [1, 1, 1]} : vector<2x8x128xf32> to vector<2x1x128xf32>
    %218 = vector.broadcast %216 : vector<2x8x1xf32> to vector<2x8x128xf32>
    %219 = vector.broadcast %217 : vector<2x1x128xf32> to vector<2x8x128xf32>
    %220 = arith.mulf %218, %219 : vector<2x8x128xf32>
    %221 = arith.addf %209, %220 : vector<2x8x128xf32>
    %222 = vector.extract_strided_slice %0 {offsets = [0, 0, 5], sizes = [2, 8, 1], strides = [1, 1, 1]} : vector<2x8x16xf32> to vector<2x8x1xf32>
    %223 = vector.extract_strided_slice %157 {offsets = [0, 5, 0], sizes = [2, 1, 128], strides = [1, 1, 1]} : vector<2x8x128xf32> to vector<2x1x128xf32>
    %224 = vector.broadcast %222 : vector<2x8x1xf32> to vector<2x8x128xf32>
    %225 = vector.broadcast %223 : vector<2x1x128xf32> to vector<2x8x128xf32>
    %226 = arith.mulf %224, %225 : vector<2x8x128xf32>
    %227 = arith.addf %215, %226 : vector<2x8x128xf32>
    %228 = vector.extract_strided_slice %0 {offsets = [0, 0, 13], sizes = [2, 8, 1], strides = [1, 1, 1]} : vector<2x8x16xf32> to vector<2x8x1xf32>
    %229 = vector.extract_strided_slice %159 {offsets = [0, 5, 0], sizes = [2, 1, 128], strides = [1, 1, 1]} : vector<2x8x128xf32> to vector<2x1x128xf32>
    %230 = vector.broadcast %228 : vector<2x8x1xf32> to vector<2x8x128xf32>
    %231 = vector.broadcast %229 : vector<2x1x128xf32> to vector<2x8x128xf32>
    %232 = arith.mulf %230, %231 : vector<2x8x128xf32>
    %233 = arith.addf %221, %232 : vector<2x8x128xf32>
    %234 = vector.extract_strided_slice %0 {offsets = [0, 0, 6], sizes = [2, 8, 1], strides = [1, 1, 1]} : vector<2x8x16xf32> to vector<2x8x1xf32>
    %235 = vector.extract_strided_slice %157 {offsets = [0, 6, 0], sizes = [2, 1, 128], strides = [1, 1, 1]} : vector<2x8x128xf32> to vector<2x1x128xf32>
    %236 = vector.broadcast %234 : vector<2x8x1xf32> to vector<2x8x128xf32>
    %237 = vector.broadcast %235 : vector<2x1x128xf32> to vector<2x8x128xf32>
    %238 = arith.mulf %236, %237 : vector<2x8x128xf32>
    %239 = arith.addf %227, %238 : vector<2x8x128xf32>
    %240 = vector.extract_strided_slice %0 {offsets = [0, 0, 14], sizes = [2, 8, 1], strides = [1, 1, 1]} : vector<2x8x16xf32> to vector<2x8x1xf32>
    %241 = vector.extract_strided_slice %159 {offsets = [0, 6, 0], sizes = [2, 1, 128], strides = [1, 1, 1]} : vector<2x8x128xf32> to vector<2x1x128xf32>
    %242 = vector.broadcast %240 : vector<2x8x1xf32> to vector<2x8x128xf32>
    %243 = vector.broadcast %241 : vector<2x1x128xf32> to vector<2x8x128xf32>
    %244 = arith.mulf %242, %243 : vector<2x8x128xf32>
    %245 = arith.addf %233, %244 : vector<2x8x128xf32>
    %246 = vector.extract_strided_slice %0 {offsets = [0, 0, 7], sizes = [2, 8, 1], strides = [1, 1, 1]} : vector<2x8x16xf32> to vector<2x8x1xf32>
    %247 = vector.extract_strided_slice %157 {offsets = [0, 7, 0], sizes = [2, 1, 128], strides = [1, 1, 1]} : vector<2x8x128xf32> to vector<2x1x128xf32>
    %248 = vector.broadcast %246 : vector<2x8x1xf32> to vector<2x8x128xf32>
    %249 = vector.broadcast %247 : vector<2x1x128xf32> to vector<2x8x128xf32>
    %250 = arith.mulf %248, %249 : vector<2x8x128xf32>
    %251 = arith.addf %239, %250 : vector<2x8x128xf32>
    %252 = vector.extract_strided_slice %0 {offsets = [0, 0, 15], sizes = [2, 8, 1], strides = [1, 1, 1]} : vector<2x8x16xf32> to vector<2x8x1xf32>
    %253 = vector.extract_strided_slice %159 {offsets = [0, 7, 0], sizes = [2, 1, 128], strides = [1, 1, 1]} : vector<2x8x128xf32> to vector<2x1x128xf32>
    %254 = vector.broadcast %252 : vector<2x8x1xf32> to vector<2x8x128xf32>
    %255 = vector.broadcast %253 : vector<2x1x128xf32> to vector<2x8x128xf32>
    %256 = arith.mulf %254, %255 : vector<2x8x128xf32>
    %257 = arith.addf %245, %256 : vector<2x8x128xf32>
    %258 = vector.shape_cast %251 : vector<2x8x128xf32> to vector<16x128xf32>
    %259 = arith.truncf %258 : vector<16x128xf32> to vector<16x128xbf16>
    %cst_25 = arith.constant dense<0.000000e+00> : vector<16x384xf32>
    %260 = tpu.matmul %259, %3, %cst_25 {dimension_numbers = #tpu.dot_dimension_numbers<[1], [0], [0], [1], [0, 0, 1, 1], [], []>} : vector<16x128xbf16>, vector<128x384xbf16>, vector<16x384xf32> -> vector<16x384xf32>
    %261 = vector.shape_cast %257 : vector<2x8x128xf32> to vector<16x128xf32>
    %262 = arith.truncf %261 : vector<16x128xf32> to vector<16x128xbf16>
    %cst_26 = arith.constant dense<0.000000e+00> : vector<16x384xf32>
    %263 = tpu.matmul %262, %5, %cst_26 {dimension_numbers = #tpu.dot_dimension_numbers<[1], [0], [0], [1], [0, 0, 1, 1], [], []>} : vector<16x128xbf16>, vector<128x384xbf16>, vector<16x384xf32> -> vector<16x384xf32>
    %264 = arith.addf %260, %263 : vector<16x384xf32>
    %265 = arith.addf %264, %11 : vector<16x384xf32>
    %266 = vector.extract_strided_slice %265 {offsets = [0, 0], sizes = [16, 128], strides = [1, 1]} : vector<16x384xf32> to vector<16x128xf32>
    %267 = vector.extract_strided_slice %265 {offsets = [0, 128], sizes = [16, 128], strides = [1, 1]} : vector<16x384xf32> to vector<16x128xf32>
    %268 = vector.extract_strided_slice %265 {offsets = [0, 256], sizes = [16, 128], strides = [1, 1]} : vector<16x384xf32> to vector<16x128xf32>
    %269 = vector.extract_strided_slice %155 {offsets = [0, 0], sizes = [16, 128], strides = [1, 1]} : vector<16x384xf32> to vector<16x128xf32>
    %270 = vector.extract_strided_slice %155 {offsets = [0, 128], sizes = [16, 128], strides = [1, 1]} : vector<16x384xf32> to vector<16x128xf32>
    %271 = vector.extract_strided_slice %155 {offsets = [0, 256], sizes = [16, 128], strides = [1, 1]} : vector<16x384xf32> to vector<16x128xf32>
    %272 = arith.addf %266, %269 : vector<16x128xf32>
    %273 = arith.negf %272 : vector<16x128xf32>
    %274 = math.exp %273 : vector<16x128xf32>
    %cst_27 = arith.constant 1.000000e+00 : f32
    %275 = vector.broadcast %cst_27 : f32 to vector<16x128xf32>
    %276 = arith.addf %275, %274 : vector<16x128xf32>
    %277 = arith.divf %275, %276 : vector<16x128xf32>
    %278 = arith.addf %267, %270 : vector<16x128xf32>
    %279 = arith.negf %278 : vector<16x128xf32>
    %280 = math.exp %279 : vector<16x128xf32>
    %cst_28 = arith.constant 1.000000e+00 : f32
    %281 = vector.broadcast %cst_28 : f32 to vector<16x128xf32>
    %282 = arith.addf %281, %280 : vector<16x128xf32>
    %283 = arith.divf %281, %282 : vector<16x128xf32>
    %284 = arith.mulf %277, %271 : vector<16x128xf32>
    %285 = arith.addf %268, %284 : vector<16x128xf32>
    %286 = math.tanh %285 : vector<16x128xf32>
    %287 = arith.subf %151, %286 : vector<16x128xf32>
    %288 = arith.mulf %283, %287 : vector<16x128xf32>
    %289 = arith.addf %286, %288 : vector<16x128xf32>
    %290 = vector.shape_cast %289 : vector<16x128xf32> to vector<2x8x128xf32>
    %c0_29 = arith.constant 0 : index
    %c0_30 = arith.constant 0 : index
    %c0_31 = arith.constant 0 : index
    %291 = vector.load %arg7[%c0_29, %c0_30, %c0_31] : memref<2x8x128xf32, #tpu.memory_space<vmem>>, vector<2x8x128xf32>
    tpu.vector_store %arg7[%c0_29, %c0_30, %c0_31], %290 {strides = array<i32>} : memref<2x8x128xf32, #tpu.memory_space<vmem>>, vector<2x8x128xf32>,
    return
  }
  func.func @transform_0(%arg0: i32) -> (i32, i32, i32) {
    %c0_i32 = arith.constant 0 : i32
    %c0_i32_0 = arith.constant 0 : i32
    %c0_i32_1 = arith.constant 0 : i32
    return %arg0, %c0_i32, %c0_i32_0 : i32, i32, i32
  }
  func.func @transform_1(%arg0: i32) -> (i32, i32, i32) {
    %c0_i32 = arith.constant 0 : i32
    %c0_i32_0 = arith.constant 0 : i32
    %c0_i32_1 = arith.constant 0 : i32
    return %arg0, %c0_i32, %c0_i32_0 : i32, i32, i32
  }
  func.func @transform_2(%arg0: i32) -> (i32, i32) {
    %c0_i32 = arith.constant 0 : i32
    %c0_i32_0 = arith.constant 0 : i32
    %c0_i32_1 = arith.constant 0 : i32
    return %c0_i32, %c0_i32_0 : i32, i32
  }
  func.func @transform_3(%arg0: i32) -> (i32, i32) {
    %c0_i32 = arith.constant 0 : i32
    %c0_i32_0 = arith.constant 0 : i32
    %c0_i32_1 = arith.constant 0 : i32
    return %c0_i32, %c0_i32_0 : i32, i32
  }
  func.func @transform_4(%arg0: i32) -> (i32, i32, i32) {
    %c0_i32 = arith.constant 0 : i32
    %c0_i32_0 = arith.constant 0 : i32
    %c0_i32_1 = arith.constant 0 : i32
    %c0_i32_2 = arith.constant 0 : i32
    return %c0_i32, %c0_i32_0, %c0_i32_1 : i32, i32, i32
  }
  func.func @transform_5(%arg0: i32) -> (i32, i32) {
    %c0_i32 = arith.constant 0 : i32
    %c0_i32_0 = arith.constant 0 : i32
    %c0_i32_1 = arith.constant 0 : i32
    return %c0_i32, %c0_i32_0 : i32, i32
  }
  func.func @transform_6(%arg0: i32) -> (i32, i32, i32) {
    %c0_i32 = arith.constant 0 : i32
    %c0_i32_0 = arith.constant 0 : i32
    %c0_i32_1 = arith.constant 0 : i32
    return %arg0, %c0_i32, %c0_i32_0 : i32, i32, i32
  }
}

</mosaic_0001>

<bundles_post_ra>
// kernel: session_graph_forward.1
= control target key start
LH: loop header
LB: loop body
LE: loop exit
PB: predicated region body
PF: predicated region fallthrough
CT: control target
= control target key end

     0   :  { %v3551_v2 = vmov 0   ;;  %v2460_v4 = vmov 9   ;;  %v2461_v7 = vmov 8   ;;  %v3553_v37 = vmov 0.0   ;;  %s3544_s0 = inlined_call_operand.vmem [shape: f32[2,8,16], index: 0, kind: input, shape index: {}]   ;;  %s3545_s1 = inlined_call_operand.vmem [shape: f32[2,8,128], index: 1, kind: input, shape index: {}]   ;;  %s3546_s2 = inlined_call_operand.vmem [shape: bf16[128,640], index: 2, kind: input, shape index: {}]   ;;  %s3547_s3 = inlined_call_operand.vmem [shape: f32[1,640], index: 3, kind: input, shape index: {}]   ;;  %s3548_s4 = inlined_call_operand.vmem [shape: bf16[2,128,384], index: 4, kind: input, shape index: {}]   ;;  %s3549_s5 = inlined_call_operand.vmem [shape: f32[1,384], index: 5, kind: input, shape index: {}]   ;;  %s3550_s6 = inlined_call_operand.hbm [shape: f32[2,8,128], index: 6, kind: output, shape index: {}]  }
   0x1   :  { %v2252_v0 = vld [vmem:[%s3546_s2 + $0x4] ss:$20 sps:$4 sm:$0xff]   ;;  %v2254_v1 = vld [vmem:[%s3546_s2] ss:$20 sps:$4 sm:$0xff]   ;;  %427 = vmatprep.mubr.bf16.mxu0 %v3551_v2  ;;  %470 = vmatprep.mubr.bf16.mxu1 %v3551_v2  ;;  %v2257_v5 = vld [vmem:[%s3546_s2 + $0x28] ss:$20 sps:$4 sm:$0xff]  }
   0x2   :  { %395 = vmatprep.subr.bf16.mxu0 %v2252_v0  ;;  %v2255_v3 = vld [vmem:[%s3546_s2 + $0x2c] ss:$20 sps:$4 sm:$0xff]   ;;  %2226 = vset.pattern.permute.xlu1 %v2460_v4  ;;  %v2258_v6 = vld [vmem:[%s3546_s2 + $0x54] ss:$20 sps:$4 sm:$0xff]   ;;  %v2260_v8 = vld [vmem:[%s3546_s2 + $0x50] ss:$20 sps:$4 sm:$0xff]  }
   0x3   :  { %396 = vmatpush1.bf16.msra.mxu0 %v2254_v1  ;;  %2225 = vset.pattern.permute.xlu0 %v2461_v7  ;;  %v2261_v9 = vld [vmem:[%s3546_s2 + $0x7c] ss:$20 sps:$4 sm:$0xff]   ;;  %v2263_v10 = vld [vmem:[%s3546_s2 + $0x78] ss:$20 sps:$4 sm:$0xff]   ;;  %v2266_v14 = vld [vmem:[%s3546_s2 + $0xa0] ss:$20 sps:$4 sm:$0xff]  }
   0x4   :  { %397 = vmatprep.subr.bf16.mxu0 %v2255_v3  ;;  %v2276_v11 = vld [vmem:[%s3546_s2 + $0xc] ss:$20 sps:$4 sm:$0xff]   ;;  %v2278_v12 = vld [vmem:[%s3546_s2 + $0x8] ss:$20 sps:$4 sm:$0xff]   ;;  %v2264_v13 = vld [vmem:[%s3546_s2 + $0xa4] ss:$20 sps:$4 sm:$0xff]  }
   0x5   :  { %438 = vmatprep.subr.bf16.mxu1 %v2276_v11  ;;  %v2280_v15 = vld [vmem:[%s3546_s2 + $0x34] ss:$20 sps:$4 sm:$0xff]   ;;  %v2282_v16 = vld [vmem:[%s3546_s2 + $0x30] ss:$20 sps:$4 sm:$0xff]   ;;  %v2267_v17 = vld [vmem:[%s3546_s2 + $0xcc] ss:$20 sps:$4 sm:$0xff]  }
   0x6   :  { %439 = vmatpush1.bf16.msra.mxu1 %v2278_v12  ;;  %v2565_v18 = vld [vmem:[%s3546_s2 + $0x5c] ss:$20 sps:$4 sm:$0xff]   ;;  %v2570_v19 = vld [vmem:[%s3546_s2 + $0x58] ss:$20 sps:$4 sm:$0xff]   ;;  %v2270_v22 = vld [vmem:[%s3546_s2 + $0xf4] ss:$20 sps:$4 sm:$0xff]  }
   0x7   :  { %398 = vmatpush1.bf16.msra.mxu0 %v2257_v5  ;;  %440 = vmatprep.subr.bf16.mxu1 %v2280_v15  ;;  %v2269_v20 = vld [vmem:[%s3546_s2 + $0xc8] ss:$20 sps:$4 sm:$0xff]   ;;  %v2579_v21 = vld [vmem:[%s3546_s2 + $0x84] ss:$20 sps:$4 sm:$0xff]   ;;  %v2591_v24 = vld [vmem:[%s3546_s2 + $0x80] ss:$20 sps:$4 sm:$0xff]  }
   0x8   :  { %399 = vmatprep.subr.bf16.mxu0 %v2258_v6  ;;  %v2272_v23 = vld [vmem:[%s3546_s2 + $0xf0] ss:$20 sps:$4 sm:$0xff]   ;;  %v2597_v25 = vld [vmem:[%s3546_s2 + $0xac] ss:$20 sps:$4 sm:$0xff]   ;;  %v2619_v30 = vld [vmem:[%s3546_s2 + $0xa8] ss:$20 sps:$4 sm:$0xff]  }
   0x9   :  { %v2602_v26 = vld [vmem:[%s3546_s2 + $0x11c] ss:$20 sps:$4 sm:$0xff]   ;;  %v2607_v27 = vld [vmem:[%s3546_s2 + $0x118] ss:$20 sps:$4 sm:$0xff]   ;;  %v184_v28 = vld [vmem:[%s3545_s1] sm:$0xff]  ;;  %vm2463_vm0 = vmmov 0  }
   0xa   :  { %441 = vmatpush1.bf16.msra.mxu1 %v2282_v16  ;;  %3633 = vst [vmem:[#allocation5_spill] sm:$0xff] %v2602_v26  ;;  %3634 = vst [vmem:[#allocation6_spill] sm:$0xff] %v2607_v27  ;;  %v185_v29 = vld [vmem:[%s3545_s1 + $0x8] sm:$0xff]  ;;  %v2279_v32 = vld [vmem:[%s3546_s2 + $0x10] ss:$20 sps:$4 sm:$0xff]   ;;  %v2464_v45 = vmov 10  }
   0xb   :  { %400 = vmatpush1.bf16.msra.mxu0 %v2260_v8  ;;  %442 = vmatprep.subr.bf16.mxu1 %v2565_v18  ;;  %v2625_v31 = vld [vmem:[%s3546_s2 + $0xd4] ss:$20 sps:$4 sm:$0xff]   ;;  %v2634_v33 = vld [vmem:[%s3546_s2 + $0xd0] ss:$20 sps:$4 sm:$0xff]   ;;  %v2636_v34 = vpack.c.bf16 %v185_v29, %v184_v28  ;;  %v2655_v38 = vld [vmem:[%s3546_s2 + $0xf8] ss:$20 sps:$4 sm:$0xff]  }
   0xc   :  { %401 = vmatprep.subr.bf16.mxu0 %v2261_v9  ;;  %3635 = vst [vmem:[#allocation7_spill] sm:$0xff] %v2625_v31  ;;  %3636 = vst [vmem:[#allocation8_spill] sm:$0xff] %v2634_v33  ;;  %v2642_v35 = vld [vmem:[%s3546_s2 + $0xfc] ss:$20 sps:$4 sm:$0xff]   ;;  %v2647_v36 = vld [vmem:[%s3544_s0] sm:$0xff]  ;;  %v2465_v47 = vmov 11  }
   0xd   :  { %3637 = vst [vmem:[#allocation9_spill] sm:$0xff] %v2642_v35  ;;  %3638 = vst [vmem:[#allocation10_spill] sm:$0xff] %v2655_v38  ;;  %585 = vperm.xlu1 %2226, %v2647_v36   ;;  %v2661_v39 = vld [vmem:[%s3544_s0 + $0x8] sm:$0xff]  ;;  %v2669_v41 = vld [vmem:[%s3546_s2 + $0x124] ss:$20 sps:$4 sm:$0xff]   ;;  %545 = vperm.xlu0 %2225, %v2647_v36   ;;  %v2466_v49 = vmov 12  }
   0xe   :  { %443 = vmatpush1.bf16.msra.mxu1 %v2570_v19  ;;  %v2283_v40 = vld [vmem:[%s3546_s2 + $0x38] ss:$20 sps:$4 sm:$0xff]   ;;  %3639 = vst [vmem:[#allocation11_spill] sm:$0xff] %v2669_v41  ;;  %v2679_v42 = vld [vmem:[%s3546_s2 + $0x120] ss:$20 sps:$4 sm:$0xff]  }
   0xf   :  { %402 = vmatpush1.bf16.msra.mxu0 %v2263_v10  ;;  %444 = vmatprep.subr.bf16.mxu1 %v2579_v21  ;;  %3640 = vst [vmem:[#allocation12_spill] sm:$0xff] %v2679_v42  ;;  %v2287_v43 = vld [vmem:[%s3546_s2 + $0x60] ss:$20 sps:$4 sm:$0xff]   ;;  %v2694_v44 = vld [vmem:[%s3546_s2 + $0x88] ss:$20 sps:$4 sm:$0xff]  }
  0x10   :  { %403 = vmatprep.subr.bf16.mxu0 %v2264_v13  ;;  %3641 = vst [vmem:[#allocation13_spill] sm:$0xff] %v2694_v44  ;;  %v2704_v46 = vld [vmem:[%s3546_s2 + $0xb0] ss:$20 sps:$4 sm:$0xff]   ;;  %v2715_v48 = vld [vmem:[%s3546_s2 + $0xd8] ss:$20 sps:$4 sm:$0xff]  }
  0x11   :  { %589 = vperm.xlu1 %2226, %v2661_v39   ;;  %549 = vperm.xlu0 %2225, %v2661_v39   ;;  %3642 = vst [vmem:[#allocation14_spill] sm:$0xff] %v2704_v46  ;;  %3643 = vst [vmem:[#allocation15_spill] sm:$0xff] %v2715_v48 }
  0x12   :  { %445 = vmatpush1.bf16.msra.mxu1 %v2591_v24 }
  0x13   :  { %404 = vmatpush1.bf16.msra.mxu0 %v2266_v14  ;;  %446 = vmatprep.subr.bf16.mxu1 %v2597_v25 }
  0x14   :  { %405 = vmatprep.subr.bf16.mxu0 %v2267_v17 }
  0x15   :  { %2228 = vset.pattern.permute.xlu1 %v2464_v45  ;;  %2227 = vset.pattern.permute.xlu0 %v2464_v45 }
  0x16   :  { %447 = vmatpush1.bf16.msra.mxu1 %v2619_v30  ;;  %629 = vperm.xlu1 %2228, %v2661_v39  }
  0x17   :  { %406 = vmatpush1.bf16.msra.mxu0 %v2269_v20  ;;  %448 = vmatprep.subr.bf16.mxu1 %v2625_v31 }
  0x18   :  { %407 = vmatprep.subr.bf16.mxu0 %v2270_v22  ;;  %625 = vperm.xlu0 %2227, %v2647_v36  }
  0x1a   :  { %449 = vmatpush1.bf16.msra.mxu1 %v2634_v33  ;;  %2229 = vset.pattern.permute.xlu1 %v2465_v47 }
  0x1b   :  { %408 = vmatpush1.bf16.msra.mxu0 %v2272_v23  ;;  %450 = vmatprep.subr.bf16.mxu1 %v2642_v35 }
  0x1c   :  { %409 = vmatprep.subr.bf16.mxu0 %v2602_v26  ;;  %665 = vperm.xlu1 %2229, %v2647_v36  }
  0x1d   :  { %2230 = vset.pattern.permute.xlu0 %v2465_v47 }
  0x1e   :  { %451 = vmatpush1.bf16.msra.mxu1 %v2655_v38  ;;  %669 = vperm.xlu0 %2230, %v2661_v39  }
  0x1f   :  { %410 = vmatpush1.bf16.msra.mxu0 %v2607_v27  ;;  %452 = vmatprep.subr.bf16.mxu1 %v2669_v41 }
  0x20   :  { %2052 = vmatprep.subr.bf16.mxu0 %v3553_v37  ;;  %2231 = vset.pattern.permute.xlu1 %v2466_v49 }
  0x21   :  { %705 = vperm.xlu1 %2231, %v2647_v36  }
  0x22   :  { %428 = vmatmul.mubr.bf16.vlgmr.msra.gmra.mrb[0].mxu0 %v2636_v34  ;;  %453 = vmatpush1.bf16.msra.mxu1 %v2679_v42 }
  0x23   :  { %2053 = vmatpush3.bf16.msra.mxu0 %v2279_v32  ;;  %2068 = vmatprep.mubr.msk.bf16.mxu0 %vm2463_vm0, %v3553_v37 }
  0x24   :  { %2054 = vmatprep.subr.bf16.mxu0 %v3553_v37  ;;  %2072 = vmatprep.subr.bf16.mxu1 %v3553_v37 }
  0x25   :  { %471 = vmatmul.mubr.bf16.vlgmr.msra.gmra.mrb[0].mxu1 %v2636_v34 }
  0x26   :  { %2088 = vmatprep.mubr.msk.bf16.mxu1 %vm2463_vm0, %v3553_v37 }
  0x27   :  { %2055 = vmatpush3.bf16.msra.mxu0 %v2283_v40 }
  0x28   :  { %2056 = vmatprep.subr.bf16.mxu0 %v3553_v37 }
  0x2b   :  { %2057 = vmatpush3.bf16.msra.mxu0 %v2287_v43 }
  0x2c   :  { %2058 = vmatprep.subr.bf16.mxu0 %v3553_v37 }
  0x2f   :  { %2059 = vmatpush3.bf16.msra.mxu0 %v2694_v44 }
  0x30   :  { %2060 = vmatprep.subr.bf16.mxu0 %v3553_v37 }
  0x33   :  { %2061 = vmatpush3.bf16.msra.mxu0 %v2704_v46 }
  0x34   :  { %2062 = vmatprep.subr.bf16.mxu0 %v3553_v37 }
  0x35   :  { %11 = vsyncpa [#allocation3], 0  ;;  %v2467_v50 = vmov 13   ;;  %v2726_v51 = vld [vmem:[%s3546_s2 + $0x100] ss:$20 sps:$4 sm:$0xff]   ;;  %709 = vperm.xlu1 %2231, %v2661_v39   ;;  %v2468_v52 = vmov 14  }
  0x36   :  { %2232 = vset.pattern.permute.xlu0 %v2467_v50  ;;  %3644 = vst [vmem:[#allocation16_spill] sm:$0xff] %v2726_v51  ;;  %v2734_v53 = vld [vmem:[%s3546_s2 + $0x128] ss:$20 sps:$4 sm:$0xff]   ;;  %v2469_v54 = vmov 1   ;;  %v2470_v55 = vmov 15   ;;  %v2471_v56 = vmov 3  }
  0x37   :  { %745 = vperm.xlu0 %2232, %v2647_v36   ;;  %2063 = vmatpush3.bf16.msra.mxu0 %v2715_v48  ;;  %3645 = vst [vmem:[#allocation17_spill] sm:$0xff] %v2734_v53  ;;  %v2472_v57 = vmov 4   ;;  %v2473_v58 = vmov 6   ;;  %v2474_v59 = vmov 7   ;;  %v2475_v60 = vmov 2  }
  0x38   :  { %2064 = vmatprep.subr.bf16.mxu0 %v3553_v37  ;;  %v2758_v61 = vld [vmem:[%s3548_s4 + $0xc0] ss:$12 sps:$4 sm:$0xff]   ;;  %v2763_v62 = vld [vmem:[%s3548_s4 + $0xc4] ss:$12 sps:$4 sm:$0xff]   ;;  %v2768_v63 = vld [vmem:[%s3548_s4 + $0xc8] ss:$12 sps:$4 sm:$0xff]  }
  0x39   :  { %2233 = vset.pattern.permute.xlu1 %v2467_v50  ;;  %3646 = vst [vmem:[#allocation18_spill] sm:$0xff] %v2758_v61  ;;  %3647 = vst [vmem:[#allocation19_spill] sm:$0xff] %v2763_v62  ;;  %2073 = vmatpush3.bf16.msra.mxu1 %v2768_v63  ;;  %v2778_v0 = vld [vmem:[%s3548_s4 + $0xd8] ss:$12 sps:$4 sm:$0xff]   ;;  %v2783_v1 = vld [vmem:[%s3548_s4 + $0xdc] ss:$12 sps:$4 sm:$0xff]  }
  0x3a   :  { %749 = vperm.xlu1 %2233, %v2661_v39   ;;  %3648 = vst [vmem:[#allocation20_spill] sm:$0xff] %v2768_v63  ;;  %2074 = vmatprep.subr.bf16.mxu1 %v3553_v37  ;;  %3649 = vst [vmem:[#allocation21_spill] sm:$0xff] %v2778_v0  ;;  %v2788_v3 = vld [vmem:[%s3548_s4 + $0xe0] ss:$12 sps:$4 sm:$0xff]   ;;  %v2476_v4 = vmov 5  }
  0x3b   :  { %2235 = vset.pattern.permute.xlu0 %v2468_v52  ;;  %2065 = vmatpush3.bf16.msra.mxu0 %v2726_v51  ;;  %3650 = vst [vmem:[#allocation22_spill] sm:$0xff] %v2783_v1  ;;  %3651 = vst [vmem:[#allocation23_spill] sm:$0xff] %v2788_v3  ;;  %v2804_v5 = vld [vmem:[%s3548_s4 + $0xf4] ss:$12 sps:$4 sm:$0xff]   ;;  %v2809_v6 = vld [vmem:[%s3548_s4 + $0xf0] ss:$12 sps:$4 sm:$0xff]  }
  0x3c   :  { %789 = vperm.xlu0 %2235, %v2661_v39   ;;  %2066 = vmatprep.subr.bf16.mxu0 %v3553_v37  ;;  %3652 = vst [vmem:[#allocation24_spill] sm:$0xff] %v2804_v5  ;;  %3653 = vst [vmem:[#allocation25_spill] sm:$0xff] %v2809_v6  ;;  %v2814_v7 = vld [vmem:[%s3548_s4 + $0xf8] ss:$12 sps:$4 sm:$0xff]   ;;  %v2828_v9 = vld [vmem:[%s3548_s4 + $0x108] ss:$12 sps:$4 sm:$0xff]  }
  0x3d   :  { %2075 = vmatpush3.bf16.msra.mxu1 %v2788_v3  ;;  %3654 = vst [vmem:[#allocation26_spill] sm:$0xff] %v2814_v7  ;;  %v2822_v8 = vld [vmem:[%s3548_s4 + $0x10c] ss:$12 sps:$4 sm:$0xff]   ;;  %3656 = vst [vmem:[#allocation28_spill] sm:$0xff] %v2828_v9  ;;  %v2833_v10 = vld [vmem:[%s3548_s4 + $0x110] ss:$12 sps:$4 sm:$0xff]  }
  0x3e   :  { %2234 = vset.pattern.permute.xlu1 %v2468_v52  ;;  %2076 = vmatprep.subr.bf16.mxu1 %v3553_v37  ;;  %3655 = vst [vmem:[#allocation27_spill] sm:$0xff] %v2822_v8  ;;  %3657 = vst [vmem:[#allocation29_spill] sm:$0xff] %v2833_v10  ;;  %v2839_v11 = vld [vmem:[%s3548_s4 + $0x124] ss:$12 sps:$4 sm:$0xff]   ;;  %v2846_v12 = vld [vmem:[%s3548_s4 + $0x120] ss:$12 sps:$4 sm:$0xff]  }
  0x3f   :  { %2067 = vmatpush3.bf16.msra.mxu0 %v2734_v53  ;;  %785 = vperm.xlu1 %2234, %v2647_v36   ;;  %3658 = vst [vmem:[#allocation30_spill] sm:$0xff] %v2839_v11  ;;  %3659 = vst [vmem:[#allocation31_spill] sm:$0xff] %v2846_v12  ;;  %v2851_v13 = vld [vmem:[%s3548_s4 + $0x128] ss:$12 sps:$4 sm:$0xff]   ;;  %v2865_v15 = vld [vmem:[%s3548_s4 + $0x138] ss:$12 sps:$4 sm:$0xff]  }
  0x40   :  { %2237 = vset.pattern.permute.xlu0 %v3551_v2  ;;  %974 = vmatprep.subr.bf16.mxu0 %v2763_v62  ;;  %3660 = vst [vmem:[#allocation32_spill] sm:$0xff] %v2851_v13  ;;  %v2858_v14 = vld [vmem:[%s3548_s4 + $0x13c] ss:$12 sps:$4 sm:$0xff]   ;;  %3662 = vst [vmem:[#allocation34_spill] sm:$0xff] %v2865_v15  ;;  %v2870_v16 = vld [vmem:[%s3548_s4 + $0x140] ss:$12 sps:$4 sm:$0xff]  }
  0x41   :  { %524 = vperm.xlu0 %2237, %v2647_v36   ;;  %2077 = vmatpush3.bf16.msra.mxu1 %v2814_v7  ;;  %3661 = vst [vmem:[#allocation33_spill] sm:$0xff] %v2858_v14  ;;  %3663 = vst [vmem:[#allocation35_spill] sm:$0xff] %v2870_v16  ;;  %v2879_v20 = vld [vmem:[%s3548_s4 + $0x154] ss:$12 sps:$4 sm:$0xff]   ;;  %v2886_v22 = vld [vmem:[%s3548_s4 + $0x150] ss:$12 sps:$4 sm:$0xff]  }
  0x42   :  { %2069 = vmatmul.mubr.bf16.vlgmr.msra.gmra.mrb[4].mxu0 %v2636_v34  ;;  %2078 = vmatprep.subr.bf16.mxu1 %v3553_v37  ;;  %3665 = vst [vmem:[#allocation37_spill] sm:$0xff] %v2879_v20  ;;  %3666 = vst [vmem:[#allocation38_spill] sm:$0xff] %v2886_v22  ;;  %v2891_v23 = vld [vmem:[%s3548_s4 + $0x158] ss:$12 sps:$4 sm:$0xff]   ;;  %v2907_v32 = vld [vmem:[%s3548_s4 + $0x168] ss:$12 sps:$4 sm:$0xff]  }
  0x43   :  { %1006 = vmatprep.mubr.bf16.mxu0 %v3551_v2  ;;  %2236 = vset.pattern.permute.xlu1 %v2470_v55  ;;  %3667 = vst [vmem:[#allocation39_spill] sm:$0xff] %v2891_v23  ;;  %v2898_v28 = vld [vmem:[%s3548_s4 + $0x16c] ss:$12 sps:$4 sm:$0xff]   ;;  %3670 = vst [vmem:[#allocation42_spill] sm:$0xff] %v2907_v32  ;;  %v2912_v34 = vld [vmem:[%s3548_s4 + $0x170] ss:$12 sps:$4 sm:$0xff]  }
  0x44   :  { %825 = vperm.xlu1 %2236, %v2647_v36   ;;  %975 = vmatpush1.bf16.msra.mxu0 %v2758_v61  ;;  %3668 = vst [vmem:[#allocation40_spill] sm:$0xff] %v2898_v28  ;;  %3671 = vst [vmem:[#allocation43_spill] sm:$0xff] %v2912_v34 }
  0x45   :  { %2240 = vset.pattern.permute.xlu0 %v2469_v54  ;;  %976 = vmatprep.subr.bf16.mxu0 %v2783_v1 }
  0x46   :  { %569 = vperm.xlu0 %2240, %v2661_v39   ;;  %2079 = vmatpush3.bf16.msra.mxu1 %v2833_v10 }
  0x47   :  { %2080 = vmatprep.subr.bf16.mxu1 %v3553_v37 }
  0x48   :  { %829 = vperm.xlu1 %2236, %v2661_v39   ;;  %977 = vmatpush1.bf16.msra.mxu0 %v2778_v0 }
  0x49   :  { %978 = vmatprep.subr.bf16.mxu0 %v2804_v5 }
  0x4a   :  { %2242 = vset.pattern.permute.xlu0 %v2471_v56  ;;  %2081 = vmatpush3.bf16.msra.mxu1 %v2851_v13 }
  0x4b   :  { %645 = vperm.xlu0 %2242, %v2647_v36   ;;  %2082 = vmatprep.subr.bf16.mxu1 %v3553_v37 }
  0x4c   :  { %2238 = vset.pattern.permute.xlu1 %v3551_v2  ;;  %979 = vmatpush1.bf16.msra.mxu0 %v2809_v6 }
  0x4d   :  { %529 = vperm.xlu1 %2238, %v2661_v39   ;;  %980 = vmatprep.subr.bf16.mxu0 %v2822_v8 }
  0x4e   :  { %2083 = vmatpush3.bf16.msra.mxu1 %v2870_v16 }
  0x4f   :  { %2245 = vset.pattern.permute.xlu0 %v2472_v57  ;;  %2084 = vmatprep.subr.bf16.mxu1 %v3553_v37 }
  0x50   :  { %689 = vperm.xlu0 %2245, %v2661_v39   ;;  %981 = vmatpush1.bf16.msra.mxu0 %v2828_v9 }
  0x51   :  { %2239 = vset.pattern.permute.xlu1 %v2469_v54  ;;  %982 = vmatprep.subr.bf16.mxu0 %v2839_v11  ;;  %v2976_v11 = vld [vmem:[%s3547_s3] sm:$0x1f] }
  0x52   :  { %565 = vperm.xlu1 %2239, %v2647_v36   ;;  %2085 = vmatpush3.bf16.msra.mxu1 %v2891_v23 }
  0x53   :  { %2086 = vmatprep.subr.bf16.mxu1 %v3553_v37 }
  0x54   :  { %2247 = vset.pattern.permute.xlu0 %v2473_v58  ;;  %983 = vmatpush1.bf16.msra.mxu0 %v2846_v12 }
  0x55   :  { %765 = vperm.xlu0 %2247, %v2647_v36   ;;  %984 = vmatprep.subr.bf16.mxu0 %v2858_v14 }
  0x56   :  { %2241 = vset.pattern.permute.xlu1 %v2475_v60  ;;  %2087 = vmatpush3.bf16.msra.mxu1 %v2912_v34 }
  0x57   :  { %605 = vperm.xlu1 %2241, %v2647_v36   ;;  %2092 = vmatprep.subr.bf16.mxu1 %v3553_v37 }
  0x58   :  { %985 = vmatpush1.bf16.msra.mxu0 %v2865_v15 }
  0x59   :  { %2250 = vset.pattern.permute.xlu0 %v2474_v59  ;;  %986 = vmatprep.subr.bf16.mxu0 %v2879_v20 }
  0x5a   :  { %809 = vperm.xlu0 %2250, %v2661_v39  }
  0x5b   :  { %609 = vperm.xlu1 %2241, %v2661_v39  }
  0x5c   :  { %987 = vmatpush1.bf16.msra.mxu0 %v2886_v22 }
  0x5d   :  { %988 = vmatprep.subr.bf16.mxu0 %v2898_v28  ;;  %v142_v28 = vlaneseq }
  0x5e   :  { %2251 = vset.pattern.permute.xlu0 %v2470_v55 }
  0x5f   :  { %2243 = vset.pattern.permute.xlu1 %v2471_v56  ;;  %v143_v15 = vshrl.u32 %v142_v28, 7 }
  0x60   :  { %649 = vperm.xlu1 %2243, %v2661_v39   ;;  %989 = vmatpush1.bf16.msra.mxu0 %v2907_v32 }
  0x61   :  { %v2969_v14 = vsub.s32 3, %v143_v15  ;;  %v2989_v1 = vsub.s32 0, %v143_v15  ;;  %v2993_v34 = vsub.s32 2, %v143_v15  ;;  %v2995_v53 = vsub.s32 1, %v143_v15 }
  0x62   :  { %v2999_v51 = vsub.s32 4, %v143_v15  ;;  %v3011_v63 = vsub.s32 6, %v143_v15 }
  0x63   :  { %v2982_v8 = vrot.slane %v2976_v11, %v2969_v14 }
  0x64   :  { %2244 = vset.pattern.permute.xlu1 %v2472_v57 }
  0x65   :  { %685 = vperm.xlu1 %2244, %v2647_v36   ;;  %3681 = vst [vmem:[#allocation53_spill] sm:$0xff] %v2982_v8 }
  0x69   :  { %2246 = vset.pattern.permute.xlu1 %v2476_v4 }
  0x6a   :  { %725 = vperm.xlu1 %2246, %v2647_v36  }
  0x6e   :  { %729 = vperm.xlu1 %2246, %v2661_v39  }
  0x72   :  { %2248 = vset.pattern.permute.xlu1 %v2473_v58 }
  0x73   :  { %769 = vperm.xlu1 %2248, %v2661_v39  }
  0x77   :  { %2249 = vset.pattern.permute.xlu1 %v2474_v59 }
  0x78   :  { %805 = vperm.xlu1 %2249, %v2647_v36   ;;  %v2919_v36 = vld [vmem:[%s3548_s4 + $0x4] ss:$12 sps:$4 sm:$0xff]  }
  0x79   :  { %3672 = vst [vmem:[#allocation44_spill] sm:$0xff] %v2919_v36  ;;  %1186 = vmatprep.subr.bf16.mxu0 %v2919_v36 }
  0x8c   :  { %v2872_v17 = vpop.permute.xlu1 %585  ;;  %v2939_v52 = vpop.permute.xlu0 %545 }
  0x8d   :  { %3664 = vst [vmem:[#allocation36_spill] sm:$0xff] %v2872_v17  ;;  %3673 = vst [vmem:[#allocation45_spill] sm:$0xff] %v2939_v52 }
  0x90   :  { %v2900_v29 = vpop.permute.xlu1 %589  ;;  %v2943_v55 = vpop.permute.xlu0 %549 }
  0x91   :  { %3669 = vst [vmem:[#allocation41_spill] sm:$0xff] %v2900_v29  ;;  %3674 = vst [vmem:[#allocation46_spill] sm:$0xff] %v2943_v55 }
  0x95   :  { %v2921_v39 = vpop.permute.xlu1 %629 }
  0x97   :  { %v2947_v57 = vpop.permute.xlu0 %625 }
  0x9b   :  { %v2927_v40 = vpop.permute.xlu1 %665 }
  0x9d   :  { %v2951_v59 = vpop.permute.xlu0 %669 }
  0xa0   :  { %v2929_v43 = vpop.permute.xlu1 %705 }
  0xb4   :  { %v2931_v45 = vpop.permute.xlu1 %709 }
  0xb6   :  { %v2955_v4 = vpop.permute.xlu0 %745 }
  0xb9   :  { %v2933_v47 = vpop.permute.xlu1 %749 }
  0xbb   :  { %v2959_v37 = vpop.permute.xlu0 %789 }
  0xbe   :  { %v2935_v49 = vpop.permute.xlu1 %785 }
  0xc0   :  { %v2963_v32 = vpop.permute.xlu0 %524 }
  0xc3   :  { %v2937_v50 = vpop.permute.xlu1 %825 }
  0xc5   :  { %v2967_v20 = vpop.permute.xlu0 %569 }
  0xc6   :  { %3679 = vst [vmem:[#allocation51_spill] sm:$0xff] %v2967_v20 }
  0xc7   :  { %v2941_v54 = vpop.permute.xlu1 %829 }
  0xca   :  { %v2978_v9 = vpop.permute.xlu0 %645 }
  0xcb   :  { %3680 = vst [vmem:[#allocation52_spill] sm:$0xff] %v2978_v9 }
  0xcc   :  { %v2945_v56 = vpop.permute.xlu1 %529 }
  0xcd   :  { %3675 = vst [vmem:[#allocation47_spill] sm:$0xff] %v2945_v56 }
  0xcf   :  { %v2997_v23 = vpop.permute.xlu0 %689 }
  0xd1   :  { %v2949_v58 = vpop.permute.xlu1 %565 }
  0xd2   :  { %3676 = vst [vmem:[#allocation48_spill] sm:$0xff] %v2949_v58 }
  0xd6   :  { %v2953_v60 = vpop.permute.xlu1 %605 }
  0xd7   :  { %3677 = vst [vmem:[#allocation49_spill] sm:$0xff] %v2953_v60 }
  0xda   :  { %v2957_v2 = vpop.permute.xlu1 %609 }
  0xdb   :  { %3678 = vst [vmem:[#allocation50_spill] sm:$0xff] %v2957_v2 }
  0xdf   :  { %v2961_v36 = vpop.permute.xlu1 %649 }
  0xe4   :  { %v2965_v22 = vpop.permute.xlu1 %685 }
  0xe9   :  { %v2971_v12 = vpop.permute.xlu1 %725 }
  0xed   :  { %v2991_v61 = vpop.permute.xlu1 %729 }
  0xf2   :  { %v3021_v38 = vpop.permute.xlu1 %769 }
  0xf8   :  { %v2984_v6 = vpop.f32.mrb[0].mxu1 }
  0xf9   :  { %3682 = vst [vmem:[#allocation54_spill] sm:$0xff] %v2984_v6  ;;  %v474_v5 = vpop.f32.mrb[1].mxu1 }
  0xfa   :  { %v475_v28 = vadd.f32 %v474_v5, %v2982_v8  ;;  %v2987_v0 = vpop.f32.mrb[2].mxu1  ;;  %v3003_v5 = vsub.s32 5, %v143_v15 }
  0xfb   :  { %3683 = vst [vmem:[#allocation55_spill] sm:$0xff] %v2987_v0  ;;  %v478_v62 = vpop.f32.mrb[3].mxu1 }
  0xfc   :  { %v479_v16 = vadd.f32 %v478_v62, %v2982_v8  ;;  %v535_v48 = vrot.slane %v475_v28, %v2989_v1  ;;  %v575_v13 = vrot.slane %v475_v28, %v2995_v53  ;;  %v615_v46 = vrot.slane %v475_v28, %v2993_v34 }
  0xfd   :  { %v655_v10 = vrot.slane %v475_v28, %v2969_v14  ;;  %v695_v62 = vrot.slane %v475_v28, %v2999_v51  ;;  %v735_v26 = vrot.slane %v475_v28, %v3003_v5 }
  0xfe   :  { %v539_v44 = vrot.slane %v479_v16, %v2989_v1  ;;  %v579_v7 = vrot.slane %v479_v16, %v2995_v53  ;;  %v619_v3 = vrot.slane %v479_v16, %v2993_v34  ;;  %v540_v8 = vmul.f32 %v535_v48, %v2963_v32 }
  0xff   :  { %v580_v0 = vmul.f32 %v575_v13, %v2949_v58  ;;  %v620_v6 = vmul.f32 %v615_v46, %v2953_v60  ;;  %v660_v33 = vmul.f32 %v655_v10, %v2978_v9  ;;  %v659_v31 = vrot.slane %v479_v16, %v2969_v14  ;;  %v3026_v13 = vpop.permute.xlu0 %765  ;;  %v3039_v58 = vpop.permute.xlu1 %805 }
 0x100   :  { %v541_v42 = vmul.f32 %v539_v44, %v2945_v56  ;;  %v621_v27 = vmul.f32 %v619_v3, %v2957_v2  ;;  %v581_v41 = vmul.f32 %v579_v7, %v2967_v20  ;;  %v699_v48 = vrot.slane %v479_v16, %v2999_v51 }
 0x101   :  { %v582_v35 = vadd.f32 %v580_v0, %v540_v8  ;;  %v739_v44 = vrot.slane %v479_v16, %v3003_v5  ;;  %v3029_v56 = vsub.s32 7, %v143_v15  ;;  %v700_v3 = vmul.f32 %v695_v62, %v2965_v22 }
 0x102   :  { %v583_v46 = vadd.f32 %v581_v41, %v541_v42  ;;  %v661_v2 = vmul.f32 %v659_v31, %v2961_v36  ;;  %v775_v0 = vrot.slane %v475_v28, %v3011_v63  ;;  %v701_v10 = vmul.f32 %v699_v48, %v2997_v23 }
 0x103   :  { %v622_v7 = vadd.f32 %v620_v6, %v582_v35  ;;  %v779_v9 = vrot.slane %v479_v16, %v3011_v63  ;;  %v740_v20 = vmul.f32 %v735_v26, %v2971_v12  ;;  %v815_v41 = vrot.slane %v475_v28, %v3029_v56 }
 0x104   :  { %v623_v8 = vadd.f32 %v621_v27, %v583_v46  ;;  %v741_v42 = vmul.f32 %v739_v44, %v2991_v61  ;;  %v819_v35 = vrot.slane %v479_v16, %v3029_v56  ;;  %v780_v6 = vmul.f32 %v775_v0, %v3026_v13  ;;  %v3043_v27 = vpop.permute.xlu0 %809 }
 0x105   :  { %v662_v60 = vadd.f32 %v660_v33, %v622_v7  ;;  %v781_v48 = vmul.f32 %v779_v9, %v3021_v38  ;;  %v820_v26 = vmul.f32 %v815_v41, %v3039_v58  ;;  %v3049_v33 = vrot.slane %v2976_v11, %v2999_v51 }
 0x106   :  { %v663_v15 = vadd.f32 %v661_v2, %v623_v8  ;;  %v821_v28 = vmul.f32 %v819_v35, %v3043_v27 }
 0x107   :  { %v702_v31 = vadd.f32 %v700_v3, %v662_v60 }
 0x108   :  { %v703_v62 = vadd.f32 %v701_v10, %v663_v15 }
 0x109   :  { %v742_v46 = vadd.f32 %v740_v20, %v702_v31 }
 0x10a   :  { %v743_v2 = vadd.f32 %v741_v42, %v703_v62 }
 0x10b   :  { %v782_v44 = vadd.f32 %v780_v6, %v742_v46 }
 0x10c   :  { %v783_v16 = vadd.f32 %v781_v48, %v743_v2 }
 0x10d   :  { %v822_v3 = vadd.f32 %v820_v26, %v782_v44 }
 0x10e   :  { %v823_v8 = vadd.f32 %v821_v28, %v783_v16 }
 0x110   :  { %v3054_v41 = vpack.c.bf16 %v823_v8, %v822_v3 }
 0x115   :  { %v515_v60 = vpop.f32.mrb[4].mxu0 }
 0x116   :  { %v516_v7 = vadd.f32 %v515_v60, %v3049_v33  ;;  %v2070_v0 = vpop.f32.mrb[5].mxu0 }
 0x117   :  { %v518_v10 = vpop.f32.mrb[6].mxu0 }
 0x118   :  { %v519_v9 = vadd.f32 %v518_v10, %v3049_v33  ;;  %v2071_v20 = vpop.f32.mrb[7].mxu0  ;;  %v555_v15 = vrot.slane %v516_v7, %v2989_v1  ;;  %v595_v42 = vrot.slane %v516_v7, %v2995_v53  ;;  %v635_v35 = vrot.slane %v516_v7, %v2993_v34 }
 0x119   :  { %v675_v31 = vrot.slane %v516_v7, %v2969_v14  ;;  %v715_v28 = vrot.slane %v516_v7, %v2999_v51  ;;  %v755_v8 = vrot.slane %v516_v7, %v3003_v5 }
 0x11a   :  { %v559_v6 = vrot.slane %v519_v9, %v2989_v1  ;;  %v560_v62 = vmul.f32 %v555_v15, %v2939_v52  ;;  %v599_v48 = vrot.slane %v519_v9, %v2995_v53  ;;  %v600_v46 = vmul.f32 %v595_v42, %v2872_v17 }
 0x11b   :  { %v639_v26 = vrot.slane %v519_v9, %v2993_v34  ;;  %v679_v2 = vrot.slane %v519_v9, %v2969_v14  ;;  %v640_v3 = vmul.f32 %v635_v35, %v2947_v57  ;;  %v719_v0 = vrot.slane %v519_v9, %v2999_v51 }
 0x11c   :  { %v561_v44 = vmul.f32 %v559_v6, %v2943_v55  ;;  %v601_v16 = vmul.f32 %v599_v48, %v2900_v29  ;;  %v602_v60 = vadd.f32 %v600_v46, %v560_v62  ;;  %v680_v42 = vmul.f32 %v675_v31, %v2927_v40 }
 0x11d   :  { %v641_v20 = vmul.f32 %v639_v26, %v2921_v39  ;;  %v681_v17 = vmul.f32 %v679_v2, %v2951_v59  ;;  %v759_v52 = vrot.slane %v519_v9, %v3003_v5  ;;  %v720_v62 = vmul.f32 %v715_v28, %v2929_v43 }
 0x11e   :  { %v603_v10 = vadd.f32 %v601_v16, %v561_v44  ;;  %v642_v15 = vadd.f32 %v640_v3, %v602_v60  ;;  %v795_v35 = vrot.slane %v516_v7, %v3011_v63  ;;  %v721_v48 = vmul.f32 %v719_v0, %v2931_v45 }
 0x11f   :  { %v760_v44 = vmul.f32 %v755_v8, %v2955_v4  ;;  %v799_v26 = vrot.slane %v519_v9, %v3011_v63  ;;  %v761_v31 = vmul.f32 %v759_v52, %v2933_v47  ;;  %v835_v2 = vrot.slane %v516_v7, %v3029_v56  ;;  %v3091_v52 = vld [vmem:[%s3548_s4] ss:$12 sps:$4 sm:$0xff]  }
 0x120   :  { %v643_v6 = vadd.f32 %v641_v20, %v603_v10  ;;  %v682_v55 = vadd.f32 %v680_v42, %v642_v15  ;;  %v800_v3 = vmul.f32 %v795_v35, %v2935_v49  ;;  %v839_v28 = vrot.slane %v519_v9, %v3029_v56  ;;  %v3101_v9 = vld [vmem:[%s3548_s4 + $0x1c] ss:$12 sps:$4 sm:$0xff]  }
 0x121   :  { %v801_v20 = vmul.f32 %v799_v26, %v2959_v37  ;;  %v3684_v35 = vmov 0.0   ;;  %v3135_v26 = vld [vmem:[%s3548_s4 + $0x38] ss:$12 sps:$4 sm:$0xff]  }
 0x122   :  { %v683_v46 = vadd.f32 %v681_v17, %v643_v6  ;;  %v722_v29 = vadd.f32 %v720_v62, %v682_v55  ;;  %v840_v55 = vmul.f32 %v835_v2, %v2937_v50  ;;  %v841_v8 = vmul.f32 %v839_v28, %v2941_v54  ;;  %v3108_v6 = vld [vmem:[%s3548_s4 + $0x18] ss:$12 sps:$4 sm:$0xff]   ;;  %v3113_v62 = vld [vmem:[%s3548_s4 + $0x20] ss:$12 sps:$4 sm:$0xff]   ;;  %3688 = vst [vmem:[#allocation58_spill] sm:$0xff] %v3135_v26 }
 0x123   :  { %v3149_v2 = vld [vmem:[%s3548_s4 + $0x48] ss:$12 sps:$4 sm:$0xff]  }
 0x124   :  { %v723_v16 = vadd.f32 %v721_v48, %v683_v46  ;;  %v762_v60 = vadd.f32 %v760_v44, %v722_v29  ;;  %v3096_v29 = vld [vmem:[%s3548_s4 + $0x8] ss:$12 sps:$4 sm:$0xff]   ;;  %v3686_v46 = vmov 0   ;;  %v3130_v44 = vld [vmem:[%s3548_s4 + $0x30] ss:$12 sps:$4 sm:$0xff]   ;;  %3690 = vst [vmem:[#allocation60_spill] sm:$0xff] %v3149_v2 }
 0x125   :  { %v3120_v48 = vld [vmem:[%s3548_s4 + $0x34] ss:$12 sps:$4 sm:$0xff]   ;;  %3687 = vst [vmem:[#allocation57_spill] sm:$0xff] %v3130_v44 }
 0x126   :  { %v763_v10 = vadd.f32 %v761_v31, %v723_v16  ;;  %v802_v0 = vadd.f32 %v800_v3, %v762_v60  ;;  %3685 = vst [vmem:[#allocation56_spill] sm:$0xff] %v3120_v48  ;;  %v3142_v31 = vld [vmem:[%s3548_s4 + $0x4c] ss:$12 sps:$4 sm:$0xff]   ;;  %v3154_v16 = vld [vmem:[%s3548_s4 + $0x50] ss:$12 sps:$4 sm:$0xff]  }
 0x127   :  { %3689 = vst [vmem:[#allocation59_spill] sm:$0xff] %v3142_v31  ;;  %3691 = vst [vmem:[#allocation61_spill] sm:$0xff] %v3154_v16  ;;  %v3161_v60 = vld [vmem:[%s3548_s4 + $0x64] ss:$12 sps:$4 sm:$0xff]   ;;  %v3168_v3 = vld [vmem:[%s3548_s4 + $0x60] ss:$12 sps:$4 sm:$0xff]  }
 0x128   :  { %v803_v17 = vadd.f32 %v801_v20, %v763_v10  ;;  %v842_v15 = vadd.f32 %v840_v55, %v802_v0  ;;  %3692 = vst [vmem:[#allocation62_spill] sm:$0xff] %v3161_v60  ;;  %3693 = vst [vmem:[#allocation63_spill] sm:$0xff] %v3168_v3  ;;  %v3173_v28 = vld [vmem:[%s3548_s4 + $0x68] ss:$12 sps:$4 sm:$0xff]   ;;  %v3187_v20 = vld [vmem:[%s3548_s4 + $0x78] ss:$12 sps:$4 sm:$0xff]  }
 0x129   :  { %3694 = vst [vmem:[#allocation64_spill] sm:$0xff] %v3173_v28  ;;  %v3180_v10 = vld [vmem:[%s3548_s4 + $0x7c] ss:$12 sps:$4 sm:$0xff]   ;;  %3696 = vst [vmem:[#allocation66_spill] sm:$0xff] %v3187_v20  ;;  %v3192_v0 = vld [vmem:[%s3548_s4 + $0x80] ss:$12 sps:$4 sm:$0xff]  }
 0x12a   :  { %v843_v42 = vadd.f32 %v841_v8, %v803_v17  ;;  %3695 = vst [vmem:[#allocation65_spill] sm:$0xff] %v3180_v10  ;;  %3697 = vst [vmem:[#allocation67_spill] sm:$0xff] %v3192_v0  ;;  %v3199_v17 = vld [vmem:[%s3548_s4 + $0x94] ss:$12 sps:$4 sm:$0xff]   ;;  %v3206_v55 = vld [vmem:[%s3548_s4 + $0x90] ss:$12 sps:$4 sm:$0xff]  }
 0x12b   :  { %3698 = vst [vmem:[#allocation68_spill] sm:$0xff] %v3199_v17  ;;  %3699 = vst [vmem:[#allocation69_spill] sm:$0xff] %v3206_v55  ;;  %v3211_v8 = vld [vmem:[%s3548_s4 + $0x98] ss:$12 sps:$4 sm:$0xff]  }
 0x12c   :  { %v845_v7 = vpack.c.bf16 %v843_v42, %v842_v15  ;;  %3700 = vst [vmem:[#allocation70_spill] sm:$0xff] %v3211_v8  ;;  %v3218_v15 = vld [vmem:[%s3548_s4 + $0xac] ss:$12 sps:$4 sm:$0xff]   ;;  %v3225_v42 = vld [vmem:[%s3548_s4 + $0xa8] ss:$12 sps:$4 sm:$0xff]  }
 0x12d   :  { %3701 = vst [vmem:[#allocation71_spill] sm:$0xff] %v3218_v15  ;;  %3702 = vst [vmem:[#allocation72_spill] sm:$0xff] %v3225_v42 }
 0x12e   :  { %1007 = vmatmul.mubr.bf16.vlgmr.msra.gmra.mrb[0].mxu0 %v845_v7  ;;  %2089 = vmatmul.mubr.bf16.vlgmr.msra.gmra.mrb[4].mxu1 %v845_v7  ;;  %v3230_v7 = vld [vmem:[%s3548_s4 + $0xb0] ss:$12 sps:$4 sm:$0xff]  }
 0x12f   :  { %1187 = vmatpush1.bf16.msra.mxu0 %v3091_v52  ;;  %2093 = vmatpush3.bf16.msra.mxu1 %v3096_v29  ;;  %3703 = vst [vmem:[#allocation73_spill] sm:$0xff] %v3230_v7 }
 0x130   :  { %1188 = vmatprep.subr.bf16.mxu0 %v3101_v9  ;;  %2094 = vmatprep.subr.bf16.mxu1 %v3684_v35 }
 0x131   :  { %1218 = vmatprep.mubr.bf16.mxu0 %v3686_v46  ;;  %2108 = vmatprep.mubr.msk.bf16.mxu1 %vm2463_vm0, %v3684_v35 }
 0x133   :  { %1189 = vmatpush1.bf16.msra.mxu0 %v3108_v6  ;;  %2095 = vmatpush3.bf16.msra.mxu1 %v3113_v62 }
 0x134   :  { %1190 = vmatprep.subr.bf16.mxu0 %v3120_v48  ;;  %2096 = vmatprep.subr.bf16.mxu1 %v3684_v35 }
 0x137   :  { %1191 = vmatpush1.bf16.msra.mxu0 %v3130_v44  ;;  %2097 = vmatpush3.bf16.msra.mxu1 %v3135_v26 }
 0x138   :  { %1192 = vmatprep.subr.bf16.mxu0 %v3142_v31  ;;  %2098 = vmatprep.subr.bf16.mxu1 %v3684_v35 }
 0x13b   :  { %1193 = vmatpush1.bf16.msra.mxu0 %v3149_v2  ;;  %2099 = vmatpush3.bf16.msra.mxu1 %v3154_v16 }
 0x13c   :  { %1194 = vmatprep.subr.bf16.mxu0 %v3161_v60  ;;  %2100 = vmatprep.subr.bf16.mxu1 %v3684_v35 }
 0x13f   :  { %1195 = vmatpush1.bf16.msra.mxu0 %v3168_v3  ;;  %2101 = vmatpush3.bf16.msra.mxu1 %v3173_v28 }
 0x140   :  { %1196 = vmatprep.subr.bf16.mxu0 %v3180_v10  ;;  %2102 = vmatprep.subr.bf16.mxu1 %v3684_v35 }
 0x143   :  { %1197 = vmatpush1.bf16.msra.mxu0 %v3187_v20  ;;  %2103 = vmatpush3.bf16.msra.mxu1 %v3192_v0 }
 0x144   :  { %1198 = vmatprep.subr.bf16.mxu0 %v3199_v17  ;;  %2104 = vmatprep.subr.bf16.mxu1 %v3684_v35 }
 0x147   :  { %1199 = vmatpush1.bf16.msra.mxu0 %v3206_v55  ;;  %2105 = vmatpush3.bf16.msra.mxu1 %v3211_v8  ;;  %v2412_v8 = vld [vmem:[%s3546_s2 + $0x4] ss:$20 sps:$4 sm:$0xff]   ;;  %v2413_v55 = vld [vmem:[%s3546_s2 + $0xc] ss:$20 sps:$4 sm:$0xff]  }
 0x148   :  { %1200 = vmatprep.subr.bf16.mxu0 %v3218_v15  ;;  %2106 = vmatprep.subr.bf16.mxu1 %v3684_v35 }
 0x14b   :  { %1201 = vmatpush1.bf16.msra.mxu0 %v3225_v42  ;;  %2107 = vmatpush3.bf16.msra.mxu1 %v3230_v7  ;;  %v2414_v42 = vld [vmem:[%s3546_s2] ss:$20 sps:$4 sm:$0xff]   ;;  %v2415_v7 = vld [vmem:[%s3546_s2 + $0x8] ss:$20 sps:$4 sm:$0xff]  }
 0x14c   :  { %1317 = vmatprep.subr.bf16.mxu1 %v2412_v8  ;;  %1360 = vmatprep.subr.bf16.mxu0 %v2413_v55  ;;  %v2416_v8 = vld [vmem:[%s3546_s2 + $0x2c] ss:$20 sps:$4 sm:$0xff]   ;;  %v2417_v55 = vld [vmem:[%s3546_s2 + $0x34] ss:$20 sps:$4 sm:$0xff]  }
 0x14e   :  { %1219 = vmatmul.mubr.bf16.vlgmr.msra.gmra.mrb[0].mxu0 %v3054_v41  ;;  %2109 = vmatmul.mubr.bf16.vlgmr.msra.gmra.mrb[8].mxu1 %v3054_v41  ;;  %v2418_v41 = vld [vmem:[%s3546_s2 + $0x28] ss:$20 sps:$4 sm:$0xff]  }
 0x14f   :  { %1318 = vmatpush1.bf16.msra.mxu1 %v2414_v42  ;;  %1361 = vmatpush1.bf16.msra.mxu0 %v2415_v7  ;;  %v2419_v42 = vld [vmem:[%s3546_s2 + $0x30] ss:$20 sps:$4 sm:$0xff]   ;;  %v2420_v7 = vld [vmem:[%s3546_s2 + $0x54] ss:$20 sps:$4 sm:$0xff]  }
 0x150   :  { %1319 = vmatprep.subr.bf16.mxu1 %v2416_v8  ;;  %1362 = vmatprep.subr.bf16.mxu0 %v2417_v55  ;;  %v2421_v8 = vld [vmem:[%s3546_s2 + $0x50] ss:$20 sps:$4 sm:$0xff]  }
 0x151   :  { %1349 = vmatprep.mubr.bf16.mxu1 %v3686_v46  ;;  %1392 = vmatprep.mubr.bf16.mxu0 %v3686_v46  ;;  %v2422_v55 = vld [vmem:[%s3546_s2 + $0x7c] ss:$20 sps:$4 sm:$0xff]  }
 0x153   :  { %1320 = vmatpush1.bf16.msra.mxu1 %v2418_v41  ;;  %1363 = vmatpush1.bf16.msra.mxu0 %v2419_v42  ;;  %v2423_v41 = vld [vmem:[%s3546_s2 + $0x78] ss:$20 sps:$4 sm:$0xff]   ;;  %v2427_v42 = vld [vmem:[%s3546_s2 + $0xc8] ss:$20 sps:$4 sm:$0xff]  }
 0x154   :  { %1321 = vmatprep.subr.bf16.mxu1 %v2420_v7  ;;  %1364 = vmatprep.subr.bf16.mxu0 %v2565_v18  ;;  %v2424_v18 = vld [vmem:[%s3546_s2 + $0xa4] ss:$20 sps:$4 sm:$0xff]   ;;  %v2428_v7 = vld [vmem:[%s3546_s2 + $0xf4] ss:$20 sps:$4 sm:$0xff]  }
 0x157   :  { %1322 = vmatpush1.bf16.msra.mxu1 %v2421_v8  ;;  %1365 = vmatpush1.bf16.msra.mxu0 %v2570_v19  ;;  %v2425_v19 = vld [vmem:[%s3546_s2 + $0xa0] ss:$20 sps:$4 sm:$0xff]   ;;  %v2429_v8 = vld [vmem:[%s3546_s2 + $0xf0] ss:$20 sps:$4 sm:$0xff]  }
 0x158   :  { %1323 = vmatprep.subr.bf16.mxu1 %v2422_v55  ;;  %1366 = vmatprep.subr.bf16.mxu0 %v2579_v21  ;;  %v2426_v21 = vld [vmem:[%s3546_s2 + $0xcc] ss:$20 sps:$4 sm:$0xff]   ;;  %v3707_v55 = vld [vmem:[#allocation10_spill] sm:$0xff] }
 0x15b   :  { %1324 = vmatpush1.bf16.msra.mxu1 %v2423_v41  ;;  %1367 = vmatpush1.bf16.msra.mxu0 %v2591_v24  ;;  %v3704_v24 = vld [vmem:[#allocation7_spill] sm:$0xff]  ;;  %v3708_v41 = vld [vmem:[#allocation5_spill] sm:$0xff] }
 0x15c   :  { %1325 = vmatprep.subr.bf16.mxu1 %v2424_v18  ;;  %1368 = vmatprep.subr.bf16.mxu0 %v2597_v25  ;;  %v3705_v25 = vld [vmem:[#allocation8_spill] sm:$0xff]  ;;  %v3709_v18 = vld [vmem:[#allocation11_spill] sm:$0xff] }
 0x15f   :  { %1326 = vmatpush1.bf16.msra.mxu1 %v2425_v19  ;;  %1369 = vmatpush1.bf16.msra.mxu0 %v2619_v30  ;;  %v3706_v30 = vld [vmem:[#allocation9_spill] sm:$0xff]  ;;  %v3710_v19 = vld [vmem:[#allocation6_spill] sm:$0xff] }
 0x160   :  { %1327 = vmatprep.subr.bf16.mxu1 %v2426_v21  ;;  %1370 = vmatprep.subr.bf16.mxu0 %v3704_v24  ;;  %v3711_v21 = vld [vmem:[#allocation12_spill] sm:$0xff] }
 0x163   :  { %1328 = vmatpush1.bf16.msra.mxu1 %v2427_v42  ;;  %1371 = vmatpush1.bf16.msra.mxu0 %v3705_v25 }
 0x164   :  { %1329 = vmatprep.subr.bf16.mxu1 %v2428_v7  ;;  %1372 = vmatprep.subr.bf16.mxu0 %v3706_v30  ;;  %v167_v30 = vld [vmem:[%s3549_s5] sm:$0x7] }
 0x167   :  { %1330 = vmatpush1.bf16.msra.mxu1 %v2429_v8  ;;  %1373 = vmatpush1.bf16.msra.mxu0 %v3707_v55  ;;  %v145_v8 = vrot.slane %v2976_v11, %v2989_v1  ;;  %v172_v55 = vrot.slane %v167_v30, %v2989_v1 }
 0x168   :  { %1331 = vmatprep.subr.bf16.mxu1 %v3708_v41  ;;  %1374 = vmatprep.subr.bf16.mxu0 %v3709_v18 }
 0x169   :  { %v3316_v41 = vadd.f32 %v172_v55, %v145_v8 }
 0x16b   :  { %1332 = vmatpush1.bf16.msra.mxu1 %v3710_v19  ;;  %1375 = vmatpush1.bf16.msra.mxu0 %v3711_v21  ;;  %3712 = vst [vmem:[#allocation7_spill] sm:$0xff] %v3316_v41 }
 0x16c   :  { %2112 = vmatprep.subr.bf16.mxu1 %v3684_v35  ;;  %2132 = vmatprep.subr.bf16.mxu0 %v3684_v35 }
 0x201   :  { %v1051_v24 = vpop.f32.mrb[4].mxu1 }
 0x202   :  { %v2090_v42 = vpop.f32.mrb[5].mxu1 }
 0x203   :  { %v1054_v25 = vpop.f32.mrb[6].mxu1  ;;  %v149_v42 = vrot.slane %v2976_v11, %v2995_v53 }
 0x204   :  { %v2091_v7 = vpop.f32.mrb[7].mxu1 }
 0x205   :  { %v176_v7 = vrot.slane %v167_v30, %v2995_v53 }
 0x207   :  { %v3323_v16 = vadd.f32 %v176_v7, %v149_v42 }
 0x209   :  { %3713 = vst [vmem:[#allocation8_spill] sm:$0xff] %v3323_v16 }
 0x221   :  { %v1220_v18 = vpop.f32.mrb[0].mxu0  ;;  %v1263_v19 = vpop.f32.mrb[8].mxu1 }
 0x222   :  { %v2173_v21 = vadd.f32 %v3316_v41, %v1220_v18  ;;  %v1264_v15 = vadd.f32 %v1263_v19, %v1051_v24  ;;  %v1222_v17 = vpop.f32.mrb[1].mxu0  ;;  %v2110_v0 = vpop.f32.mrb[9].mxu1 }
 0x223   :  { %v1224_v20 = vpop.f32.mrb[2].mxu0  ;;  %v1266_v10 = vpop.f32.mrb[10].mxu1  ;;  %v2175_v24 = vadd.f32 %v3323_v16, %v1222_v17  ;;  %v3716_v17 = vld [vmem:[#allocation54_spill] sm:$0xff] }
 0x224   :  { %v1990_v28 = vmul.f32 -1.442695, %v2173_v21  ;;  %v2177_v3 = vadd.f32 %v3316_v41, %v1224_v20  ;;  %v1267_v60 = vadd.f32 %v1266_v10, %v1054_v25  ;;  %v1226_v8 = vpop.f32.mrb[3].mxu0  ;;  %v2111_v55 = vpop.f32.mrb[11].mxu1 }
 0x225   :  { %v2179_v19 = vadd.f32 %v3323_v16, %v1226_v8  ;;  %v1992_v2 = vmul.f32 -1.442695, %v2175_v24  ;;  %v3758_v16 = vld [vmem:[#allocation52_spill] sm:$0xff] }
 0x226   :  { %2372 = vpow2.f32 %v1990_v28  ;;  %v1991_v18 = vmul.f32 -1.442695, %v2177_v3  ;;  %v3329_v28 = vrot.slane %v2976_v11, %v2993_v34  ;;  %v3332_v3 = vrot.slane %v167_v30, %v2993_v34 }
 0x227   :  { %v1993_v0 = vmul.f32 -1.442695, %v2179_v19 }
 0x228   :  { %2374 = vpow2.f32 %v1991_v18  ;;  %3714 = vst [vmem:[#allocation9_spill] sm:$0xff] %v3329_v28  ;;  %3715 = vst [vmem:[#allocation10_spill] sm:$0xff] %v3332_v3  ;;  %v473_v25 = vadd.f32 %v3716_v17, %v3329_v28  ;;  %v1275_v11 = vadd.f32 %v1267_v60, %v3332_v3 }
 0x229   :  { %2376 = vpow2.f32 %v1992_v2 }
 0x230   :  { %v2373_v31 = vpop.eup %2372 }
 0x231   :  { %v1284_v26 = vadd.f32 1.0, %v2373_v31  ;;  %v3717_v31 = vld [vmem:[#allocation55_spill] sm:$0xff] }
 0x232   :  { %v2375_v44 = vpop.eup %2374  ;;  %v477_v2 = vadd.f32 %v3717_v31, %v3329_v28  ;;  %v3757_v28 = vld [vmem:[#allocation50_spill] sm:$0xff] }
 0x233   :  { %2378 = vrcp.f32 %v1284_v26  ;;  %v1285_v20 = vadd.f32 1.0, %v2375_v44  ;;  %v2377_v10 = vpop.eup %2376  ;;  %v1272_v44 = vadd.f32 %v1264_v15, %v3332_v3 }
 0x234   :  { %2380 = vpow2.f32 %v1993_v0  ;;  %v1298_v8 = vadd.f32 1.0, %v2377_v10  ;;  %v2431_v10 = vld [vmem:[%s3545_s1 + $0x8] sm:$0xff] }
 0x235   :  { %2382 = vrcp.f32 %v1285_v20  ;;  %v2430_v20 = vld [vmem:[%s3545_s1] sm:$0xff] }
 0x23d   :  { %v2379_v21 = vpop.eup %2378 }
 0x23e   :  { %v2381_v42 = vpop.eup %2380  ;;  %v1304_v26 = vmul.f32 %v2379_v21, %v473_v25 }
 0x23f   :  { %v2383_v7 = vpop.eup %2382  ;;  %v1299_v24 = vadd.f32 1.0, %v2381_v42 }
 0x240   :  { %v1306_v55 = vadd.f32 %v1304_v26, %v1272_v44  ;;  %v1305_v18 = vmul.f32 %v2383_v7, %v477_v2  ;;  %v2432_v26 = vld [vmem:[%s3546_s2 + $0x10] ss:$20 sps:$4 sm:$0xff]   ;;  %v3720_v7 = vld [vmem:[#allocation20_spill] sm:$0xff] }
 0x242   :  { %2384 = vtanh.f32 %v1306_v55  ;;  %v1307_v30 = vadd.f32 %v1305_v18, %v1275_v11  ;;  %v3721_v55 = vld [vmem:[#allocation23_spill] sm:$0xff]  ;;  %v3722_v18 = vld [vmem:[#allocation26_spill] sm:$0xff] }
 0x243   :  { %2386 = vrcp.f32 %v1298_v8  ;;  %v2433_v8 = vld [vmem:[%s3546_s2 + $0x38] ss:$20 sps:$4 sm:$0xff]   ;;  %v2434_v11 = vld [vmem:[%s3546_s2 + $0x60] ss:$20 sps:$4 sm:$0xff]   ;;  %s2477_s2 = smov [#allocation2]  }
 0x244   :  { %2388 = vtanh.f32 %v1307_v30  ;;  %v3723_v30 = vld [vmem:[#allocation13_spill] sm:$0xff]  ;;  %s1859_s24 = sshll.u32 %s2477_s2, 4  ;;  %s1860_s24 = int_to_ptr.vmem [resolvable:$true] %s1859_s24 }
 0x245   :  { %2390 = vrcp.f32 %v1299_v24  ;;  %v3724_v24 = vld [vmem:[#allocation29_spill] sm:$0xff]  ;;  %s2435_s25 = scalar_lea.vmem %s1860_s24, 256  ;;  %p2440_p1 = scmp.lt.s32.totalorder %s1860_s24, %s1860_s24 }
 0x246   :  { %p2436_p0 = scmp.ne.s32.totalorder %s1860_s24, %s2435_s25  ;;  %p2441_p2 = scmp.lt.s32.totalorder %s2435_s25, %s2435_s25 }
 0x248   :  { %p2442_p3 = por %p2441_p2, %p2440_p1 }
 0x24a   :  { %p2443_p4 = pnand %p2442_p3, %p2436_p0 }
 0x24c   :  { %v2385_v19 = vpop.eup %2384 }
 0x24d   :  { %v2387_v0 = vpop.eup %2386  ;;  %v1310_v15 = vsub.f32 %v2430_v20, %v2385_v19  ;;  %v3727_v20 = vld [vmem:[#allocation15_spill] sm:$0xff] }
 0x24e   :  { %v2389_v17 = vpop.eup %2388 }
 0x24f   :  { %v1311_v60 = vsub.f32 %v2431_v10, %v2389_v17  ;;  %v1312_v25 = vmul.f32 %v2387_v0, %v1310_v15  ;;  %v2391_v21 = vpop.eup %2390  ;;  %v3726_v0 = vld [vmem:[#allocation32_spill] sm:$0xff]  ;;  %v3728_v15 = vld [vmem:[#allocation35_spill] sm:$0xff] }
 0x250   :  { %v3730_v10 = vld [vmem:[#allocation39_spill] sm:$0xff] }
 0x251   :  { %v1313_v31 = vmul.f32 %v2391_v21, %v1311_v60  ;;  %v3346_v42 = vadd.f32 %v2385_v19, %v1312_v25  ;;  %v3725_v19 = vld [vmem:[#allocation14_spill] sm:$0xff]  ;;  %v3731_v60 = vld [vmem:[#allocation17_spill] sm:$0xff]  ;;  %v3732_v25 = vld [vmem:[#allocation19_spill] sm:$0xff] }
 0x252   :  { %v3733_v21 = vld [vmem:[#allocation43_spill] sm:$0xff] }
 0x253   :  { %3718 = vst [vmem:[#allocation5_spill] sm:$0xff] %v3346_v42  ;;  %v3348_v2 = vadd.f32 %v2389_v17, %v1313_v31  ;;  %v3729_v17 = vld [vmem:[#allocation16_spill] sm:$0xff]  ;;  %v3734_v31 = vld [vmem:[#allocation18_spill] sm:$0xff] }
 0x255   :  { %3719 = vst [vmem:[#allocation11_spill] sm:$0xff] %v3348_v2  ;;  %v1316_v44 = vpack.c.bf16 %v3348_v2, %v3346_v42  ;;  %v3756_v2 = vld [vmem:[#allocation51_spill] sm:$0xff] }
 0x257   :  { %1350 = vmatmul.mubr.bf16.vlgmr.msra.gmra.mrb[12].mxu1 %v1316_v44  ;;  %1393 = vmatmul.mubr.bf16.vlgmr.msra.gmra.mrb[8].mxu0 %v1316_v44 }
 0x258   :  { %2113 = vmatpush3.bf16.msra.mxu1 %v2432_v26  ;;  %2128 = vmatprep.mubr.msk.bf16.mxu1 %vm2463_vm0, %v3684_v35  ;;  %v3735_v26 = vld [vmem:[#allocation22_spill] sm:$0xff] }
 0x259   :  { %2114 = vmatprep.subr.bf16.mxu1 %v3684_v35  ;;  %2133 = vmatpush3.bf16.msra.mxu0 %v3720_v7  ;;  %v3736_v7 = vld [vmem:[#allocation21_spill] sm:$0xff] }
 0x25a   :  { %2134 = vmatprep.subr.bf16.mxu0 %v3684_v35  ;;  %2148 = vmatprep.mubr.msk.bf16.mxu0 %vm2463_vm0, %v3684_v35 }
 0x25c   :  { %2115 = vmatpush3.bf16.msra.mxu1 %v2433_v8  ;;  %v3737_v8 = vld [vmem:[#allocation24_spill] sm:$0xff] }
 0x25d   :  { %2116 = vmatprep.subr.bf16.mxu1 %v3684_v35  ;;  %2135 = vmatpush3.bf16.msra.mxu0 %v3721_v55  ;;  %v3738_v55 = vld [vmem:[#allocation25_spill] sm:$0xff] }
 0x25e   :  { %2136 = vmatprep.subr.bf16.mxu0 %v3684_v35 }
 0x260   :  { %2117 = vmatpush3.bf16.msra.mxu1 %v2434_v11  ;;  %v3739_v11 = vld [vmem:[#allocation27_spill] sm:$0xff] }
 0x261   :  { %2118 = vmatprep.subr.bf16.mxu1 %v3684_v35  ;;  %2137 = vmatpush3.bf16.msra.mxu0 %v3722_v18  ;;  %v3740_v18 = vld [vmem:[#allocation28_spill] sm:$0xff] }
 0x262   :  { %2138 = vmatprep.subr.bf16.mxu0 %v3684_v35 }
 0x264   :  { %2119 = vmatpush3.bf16.msra.mxu1 %v3723_v30  ;;  %v3741_v30 = vld [vmem:[#allocation30_spill] sm:$0xff] }
 0x265   :  { %2120 = vmatprep.subr.bf16.mxu1 %v3684_v35  ;;  %2139 = vmatpush3.bf16.msra.mxu0 %v3724_v24  ;;  %v3742_v24 = vld [vmem:[#allocation31_spill] sm:$0xff] }
 0x266   :  { %2140 = vmatprep.subr.bf16.mxu0 %v3684_v35 }
 0x268   :  { %2121 = vmatpush3.bf16.msra.mxu1 %v3725_v19  ;;  %v3744_v19 = vld [vmem:[#allocation34_spill] sm:$0xff] }
 0x269   :  { %2122 = vmatprep.subr.bf16.mxu1 %v3684_v35  ;;  %2141 = vmatpush3.bf16.msra.mxu0 %v3726_v0  ;;  %v3745_v0 = vld [vmem:[#allocation37_spill] sm:$0xff] }
 0x26a   :  { %2142 = vmatprep.subr.bf16.mxu0 %v3684_v35 }
 0x26c   :  { %2123 = vmatpush3.bf16.msra.mxu1 %v3727_v20  ;;  %v3746_v20 = vld [vmem:[#allocation38_spill] sm:$0xff] }
 0x26d   :  { %2124 = vmatprep.subr.bf16.mxu1 %v3684_v35  ;;  %2143 = vmatpush3.bf16.msra.mxu0 %v3728_v15  ;;  %v3747_v15 = vld [vmem:[#allocation40_spill] sm:$0xff] }
 0x26e   :  { %2144 = vmatprep.subr.bf16.mxu0 %v3684_v35 }
 0x270   :  { %2125 = vmatpush3.bf16.msra.mxu1 %v3729_v17  ;;  %v3748_v17 = vld [vmem:[#allocation42_spill] sm:$0xff] }
 0x271   :  { %2126 = vmatprep.subr.bf16.mxu1 %v3684_v35  ;;  %2145 = vmatpush3.bf16.msra.mxu0 %v3730_v10  ;;  %v3749_v10 = vld [vmem:[#allocation44_spill] sm:$0xff] }
 0x272   :  { %2146 = vmatprep.subr.bf16.mxu0 %v3684_v35 }
 0x274   :  { %2127 = vmatpush3.bf16.msra.mxu1 %v3731_v60 }
 0x275   :  { %1638 = vmatprep.subr.bf16.mxu1 %v3732_v25  ;;  %2147 = vmatpush3.bf16.msra.mxu0 %v3733_v21  ;;  %v3751_v21 = vld [vmem:[#allocation53_spill] sm:$0xff] }
 0x276   :  { %2152 = vmatprep.subr.bf16.mxu0 %v3684_v35 }
 0x277   :  { %2129 = vmatmul.mubr.bf16.vlgmr.msra.gmra.mrb[16].mxu1 %v1316_v44  ;;  %v3743_v44 = vld [vmem:[#allocation33_spill] sm:$0xff] }
 0x278   :  { %1639 = vmatpush1.bf16.msra.mxu1 %v3734_v31  ;;  %1670 = vmatprep.mubr.bf16.mxu1 %v3686_v46 }
 0x279   :  { %1640 = vmatprep.subr.bf16.mxu1 %v3735_v26 }
 0x27c   :  { %1641 = vmatpush1.bf16.msra.mxu1 %v3736_v7 }
 0x27d   :  { %1642 = vmatprep.subr.bf16.mxu1 %v3737_v8 }
 0x280   :  { %1643 = vmatpush1.bf16.msra.mxu1 %v3738_v55 }
 0x281   :  { %1644 = vmatprep.subr.bf16.mxu1 %v3739_v11 }
 0x284   :  { %1645 = vmatpush1.bf16.msra.mxu1 %v3740_v18 }
 0x285   :  { %1646 = vmatprep.subr.bf16.mxu1 %v3741_v30 }
 0x288   :  { %1647 = vmatpush1.bf16.msra.mxu1 %v3742_v24 }
 0x289   :  { %1648 = vmatprep.subr.bf16.mxu1 %v3743_v44 }
 0x28c   :  { %1649 = vmatpush1.bf16.msra.mxu1 %v3744_v19 }
 0x28d   :  { %1650 = vmatprep.subr.bf16.mxu1 %v3745_v0  ;;  %v3753_v0 = vld [vmem:[#allocation48_spill] sm:$0xff] }
 0x290   :  { %1651 = vmatpush1.bf16.msra.mxu1 %v3746_v20 }
 0x291   :  { %1652 = vmatprep.subr.bf16.mxu1 %v3747_v15 }
 0x294   :  { %1653 = vmatpush1.bf16.msra.mxu1 %v3748_v17  ;;  %v3754_v17 = vld [vmem:[#allocation49_spill] sm:$0xff] }
 0x295   :  { %1722 = vmatprep.subr.bf16.mxu1 %v3749_v10 }
 0x32a   :  { %v3411_v60 = vpop.f32.mrb[8].mxu0 }
 0x32b   :  { %3750 = vst [vmem:[#allocation6_spill] sm:$0xff] %v3411_v60  ;;  %v1396_v25 = vpop.f32.mrb[9].mxu0 }
 0x32c   :  { %v1397_v31 = vadd.f32 %v1396_v25, %v3751_v21  ;;  %v3414_v26 = vpop.f32.mrb[10].mxu0 }
 0x32d   :  { %3752 = vst [vmem:[#allocation12_spill] sm:$0xff] %v3414_v26  ;;  %v1400_v7 = vpop.f32.mrb[11].mxu0 }
 0x32e   :  { %v1401_v8 = vadd.f32 %v1400_v7, %v3751_v21  ;;  %v1447_v55 = vrot.slane %v1397_v31, %v2989_v1  ;;  %v1471_v11 = vrot.slane %v1397_v31, %v2995_v53  ;;  %v1495_v18 = vrot.slane %v1397_v31, %v2993_v34  ;;  %v3755_v21 = vld [vmem:[#allocation47_spill] sm:$0xff] }
 0x32f   :  { %v1519_v30 = vrot.slane %v1397_v31, %v2969_v14  ;;  %v1543_v25 = vrot.slane %v1397_v31, %v2999_v51 }
 0x330   :  { %v1451_v24 = vrot.slane %v1401_v8, %v2989_v1  ;;  %v1452_v44 = vmul.f32 %v1447_v55, %v2963_v32  ;;  %v1475_v19 = vrot.slane %v1401_v8, %v2995_v53  ;;  %v1476_v20 = vmul.f32 %v1471_v11, %v3753_v0 }
 0x331   :  { %v1499_v15 = vrot.slane %v1401_v8, %v2993_v34  ;;  %v1500_v10 = vmul.f32 %v1495_v18, %v3754_v17  ;;  %v1523_v26 = vrot.slane %v1401_v8, %v2969_v14  ;;  %v1547_v60 = vrot.slane %v1401_v8, %v2999_v51 }
 0x332   :  { %v1453_v7 = vmul.f32 %v1451_v24, %v3755_v21  ;;  %v1477_v42 = vmul.f32 %v1475_v19, %v3756_v2  ;;  %v1478_v3 = vadd.f32 %v1476_v20, %v1452_v44  ;;  %v1567_v32 = vrot.slane %v1397_v31, %v3003_v5 }
 0x333   :  { %v1501_v11 = vmul.f32 %v1499_v15, %v3757_v28  ;;  %v1524_v41 = vmul.f32 %v1519_v30, %v3758_v16  ;;  %v1571_v18 = vrot.slane %v1401_v8, %v3003_v5  ;;  %v1591_v17 = vrot.slane %v1397_v31, %v3011_v63 }
 0x334   :  { %v1479_v55 = vadd.f32 %v1477_v42, %v1453_v7  ;;  %v1502_v0 = vadd.f32 %v1500_v10, %v1478_v3  ;;  %v1525_v2 = vmul.f32 %v1523_v26, %v2961_v36  ;;  %v1548_v19 = vmul.f32 %v1543_v25, %v2965_v22 }
 0x335   :  { %v1549_v20 = vmul.f32 %v1547_v60, %v2997_v23  ;;  %v1572_v42 = vmul.f32 %v1567_v32, %v2971_v12  ;;  %v1595_v28 = vrot.slane %v1401_v8, %v3011_v63  ;;  %v1573_v16 = vmul.f32 %v1571_v18, %v2991_v61  ;;  %v3759_v18 = vld [vmem:[#allocation45_spill] sm:$0xff] }
 0x336   :  { %v1503_v24 = vadd.f32 %v1501_v11, %v1479_v55  ;;  %v1526_v44 = vadd.f32 %v1524_v41, %v1502_v0  ;;  %v1596_v3 = vmul.f32 %v1591_v17, %v3026_v13  ;;  %v1615_v10 = vrot.slane %v1397_v31, %v3029_v56 }
 0x337   :  { %v1619_v36 = vrot.slane %v1401_v8, %v3029_v56  ;;  %v1597_v22 = vmul.f32 %v1595_v28, %v3021_v38  ;;  %v3762_v28 = vld [vmem:[#allocation41_spill] sm:$0xff] }
 0x338   :  { %v1527_v21 = vadd.f32 %v1525_v2, %v1503_v24  ;;  %v1550_v48 = vadd.f32 %v1548_v19, %v1526_v44  ;;  %v1620_v26 = vmul.f32 %v1615_v10, %v3039_v58  ;;  %v3760_v2 = vld [vmem:[#allocation36_spill] sm:$0xff] }
 0x339   :  { %v1621_v12 = vmul.f32 %v1619_v36, %v3043_v27 }
 0x33a   :  { %v1551_v30 = vadd.f32 %v1549_v20, %v1527_v21  ;;  %v1574_v15 = vadd.f32 %v1572_v42, %v1550_v48  ;;  %v3761_v21 = vld [vmem:[#allocation46_spill] sm:$0xff] }
 0x33c   :  { %v1575_v41 = vadd.f32 %v1573_v16, %v1551_v30  ;;  %v1598_v23 = vadd.f32 %v1596_v3, %v1574_v15 }
 0x33e   :  { %v1599_v60 = vadd.f32 %v1597_v22, %v1575_v41  ;;  %v1622_v25 = vadd.f32 %v1620_v26, %v1598_v23 }
 0x340   :  { %v1623_v7 = vadd.f32 %v1621_v12, %v1599_v60 }
 0x342   :  { %v3449_v61 = vpack.c.bf16 %v1623_v7, %v1622_v25 }
 0x34a   :  { %v1437_v13 = vpop.f32.mrb[16].mxu1 }
 0x34b   :  { %v1438_v48 = vadd.f32 %v1437_v13, %v3049_v33  ;;  %v2130_v32 = vpop.f32.mrb[17].mxu1 }
 0x34c   :  { %v1440_v31 = vpop.f32.mrb[18].mxu1 }
 0x34d   :  { %v1441_v8 = vadd.f32 %v1440_v31, %v3049_v33  ;;  %v2131_v55 = vpop.f32.mrb[19].mxu1  ;;  %v1459_v38 = vrot.slane %v1438_v48, %v2989_v1  ;;  %v1483_v11 = vrot.slane %v1438_v48, %v2995_v53  ;;  %v1507_v58 = vrot.slane %v1438_v48, %v2993_v34 }
 0x34e   :  { %v1531_v27 = vrot.slane %v1438_v48, %v2969_v14  ;;  %v1555_v20 = vrot.slane %v1438_v48, %v2999_v51  ;;  %v1579_v15 = vrot.slane %v1438_v48, %v3003_v5  ;;  %v1603_v41 = vrot.slane %v1438_v48, %v3011_v63 }
 0x34f   :  { %v1463_v0 = vrot.slane %v1441_v8, %v2989_v1  ;;  %v1464_v17 = vmul.f32 %v1459_v38, %v3759_v18  ;;  %v1487_v24 = vrot.slane %v1441_v8, %v2995_v53  ;;  %v1488_v44 = vmul.f32 %v1483_v11, %v3760_v2  ;;  %v3779_v18 = vld [vmem:[#allocation72_spill] sm:$0xff] }
 0x350   :  { %v1511_v19 = vrot.slane %v1441_v8, %v2993_v34  ;;  %v1512_v33 = vmul.f32 %v1507_v58, %v2947_v57  ;;  %v1535_v30 = vrot.slane %v1441_v8, %v2969_v14  ;;  %v1559_v1 = vrot.slane %v1441_v8, %v2999_v51  ;;  %v3776_v58 = vld [vmem:[#allocation69_spill] sm:$0xff] }
 0x351   :  { %v1465_v42 = vmul.f32 %v1463_v0, %v3761_v21  ;;  %v1489_v16 = vmul.f32 %v1487_v24, %v3762_v28  ;;  %v1490_v3 = vadd.f32 %v1488_v44, %v1464_v17  ;;  %v1536_v34 = vmul.f32 %v1531_v27, %v2927_v40  ;;  %v3777_v27 = vld [vmem:[#allocation70_spill] sm:$0xff]  ;;  %v3778_v0 = vld [vmem:[#allocation71_spill] sm:$0xff]  ;;  %v3780_v17 = vld [vmem:[#allocation73_spill] sm:$0xff] }
 0x352   :  { %v1513_v10 = vmul.f32 %v1511_v19, %v2921_v39  ;;  %v1583_v57 = vrot.slane %v1441_v8, %v3003_v5  ;;  %v1537_v23 = vmul.f32 %v1535_v30, %v2951_v59  ;;  %v1560_v14 = vmul.f32 %v1555_v20, %v2929_v43  ;;  %v3781_v21 = vld [vmem:[#allocation7_spill] sm:$0xff] }
 0x353   :  { %v1491_v53 = vadd.f32 %v1489_v16, %v1465_v42  ;;  %v1514_v36 = vadd.f32 %v1512_v33, %v1490_v3  ;;  %v1561_v51 = vmul.f32 %v1559_v1, %v2931_v45  ;;  %v1584_v25 = vmul.f32 %v1579_v15, %v2955_v4 }
 0x354   :  { %v1607_v39 = vrot.slane %v1441_v8, %v3011_v63  ;;  %v1585_v40 = vmul.f32 %v1583_v57, %v2933_v47  ;;  %v1608_v5 = vmul.f32 %v1603_v41, %v2935_v49  ;;  %v1627_v32 = vrot.slane %v1438_v48, %v3029_v56  ;;  %v3764_v49 = vld [vmem:[#allocation57_spill] sm:$0xff]  ;;  %v3774_v48 = vld [vmem:[#allocation67_spill] sm:$0xff] }
 0x355   :  { %v1515_v22 = vadd.f32 %v1513_v10, %v1491_v53  ;;  %v1538_v60 = vadd.f32 %v1536_v34, %v1514_v36  ;;  %v1631_v59 = vrot.slane %v1441_v8, %v3029_v56  ;;  %v3767_v56 = vld [vmem:[#allocation60_spill] sm:$0xff] }
 0x356   :  { %v1609_v43 = vmul.f32 %v1607_v39, %v2959_v37  ;;  %v1632_v38 = vmul.f32 %v1627_v32, %v2937_v50  ;;  %v3763_v37 = vld [vmem:[#allocation56_spill] sm:$0xff]  ;;  %v3765_v50 = vld [vmem:[#allocation58_spill] sm:$0xff] }
 0x357   :  { %v1539_v26 = vadd.f32 %v1537_v23, %v1515_v22  ;;  %v1562_v12 = vadd.f32 %v1560_v14, %v1538_v60  ;;  %v1633_v4 = vmul.f32 %v1631_v59, %v2941_v54  ;;  %v3766_v54 = vld [vmem:[#allocation59_spill] sm:$0xff]  ;;  %v3775_v8 = vld [vmem:[#allocation68_spill] sm:$0xff]  ;;  %v3784_v39 = vld [vmem:[#allocation6_spill] sm:$0xff] }
 0x358   :  { %v3782_v34 = vld [vmem:[#allocation8_spill] sm:$0xff]  ;;  %v3786_v59 = vld [vmem:[#allocation10_spill] sm:$0xff] }
 0x359   :  { %v1563_v7 = vadd.f32 %v1561_v51, %v1539_v26  ;;  %v1586_v13 = vadd.f32 %v1584_v25, %v1562_v12  ;;  %v3783_v25 = vld [vmem:[#allocation9_spill] sm:$0xff] }
 0x35b   :  { %v1587_v31 = vadd.f32 %v1585_v40, %v1563_v7  ;;  %v1610_v45 = vadd.f32 %v1608_v5, %v1586_v13  ;;  %v1395_v40 = vadd.f32 %v3784_v39, %v3783_v25  ;;  %v3785_v13 = vld [vmem:[#allocation12_spill] sm:$0xff] }
 0x35c   :  { %v1399_v32 = vadd.f32 %v3785_v13, %v3783_v25 }
 0x35d   :  { %v1611_v55 = vadd.f32 %v1609_v43, %v1587_v31  ;;  %v1634_v63 = vadd.f32 %v1632_v38, %v1610_v45 }
 0x35f   :  { %v1635_v11 = vadd.f32 %v1633_v4, %v1611_v55 }
 0x361   :  { %v1637_v47 = vpack.c.bf16 %v1635_v11, %v1634_v63 }
 0x363   :  { %1671 = vmatmul.mubr.bf16.vlgmr.msra.gmra.mrb[12].mxu1 %v1637_v47  ;;  %2149 = vmatmul.mubr.bf16.vlgmr.msra.gmra.mrb[12].mxu0 %v1637_v47 }
 0x364   :  { %1723 = vmatpush1.bf16.msra.mxu1 %v3091_v52  ;;  %2153 = vmatpush3.bf16.msra.mxu0 %v3096_v29  ;;  %v3768_v52 = vld [vmem:[#allocation61_spill] sm:$0xff]  ;;  %v3769_v29 = vld [vmem:[#allocation62_spill] sm:$0xff] }
 0x365   :  { %1724 = vmatprep.subr.bf16.mxu1 %v3101_v9  ;;  %2154 = vmatprep.subr.bf16.mxu0 %v3684_v35  ;;  %v3770_v9 = vld [vmem:[#allocation63_spill] sm:$0xff] }
 0x366   :  { %1754 = vmatprep.mubr.bf16.mxu1 %v3686_v46  ;;  %2168 = vmatprep.mubr.msk.bf16.mxu0 %vm2463_vm0, %v3684_v35  ;;  %v3773_v46 = vld [vmem:[#allocation66_spill] sm:$0xff] }
 0x368   :  { %1725 = vmatpush1.bf16.msra.mxu1 %v3108_v6  ;;  %2155 = vmatpush3.bf16.msra.mxu0 %v3113_v62  ;;  %v3771_v6 = vld [vmem:[#allocation64_spill] sm:$0xff]  ;;  %v3772_v62 = vld [vmem:[#allocation65_spill] sm:$0xff] }
 0x369   :  { %1726 = vmatprep.subr.bf16.mxu1 %v3763_v37  ;;  %2156 = vmatprep.subr.bf16.mxu0 %v3684_v35 }
 0x36c   :  { %1727 = vmatpush1.bf16.msra.mxu1 %v3764_v49  ;;  %2157 = vmatpush3.bf16.msra.mxu0 %v3765_v50  ;;  %v3787_v50 = vld [vmem:[#allocation5_spill] sm:$0xff] }
 0x36d   :  { %1728 = vmatprep.subr.bf16.mxu1 %v3766_v54  ;;  %2158 = vmatprep.subr.bf16.mxu0 %v3684_v35 }
 0x370   :  { %1729 = vmatpush1.bf16.msra.mxu1 %v3767_v56  ;;  %2159 = vmatpush3.bf16.msra.mxu0 %v3768_v52  ;;  %v3788_v52 = vld [vmem:[#allocation11_spill] sm:$0xff] }
 0x371   :  { %1730 = vmatprep.subr.bf16.mxu1 %v3769_v29  ;;  %2160 = vmatprep.subr.bf16.mxu0 %v3684_v35 }
 0x374   :  { %1731 = vmatpush1.bf16.msra.mxu1 %v3770_v9  ;;  %2161 = vmatpush3.bf16.msra.mxu0 %v3771_v6 }
 0x375   :  { %1732 = vmatprep.subr.bf16.mxu1 %v3772_v62  ;;  %2162 = vmatprep.subr.bf16.mxu0 %v3684_v35 }
 0x378   :  { %1733 = vmatpush1.bf16.msra.mxu1 %v3773_v46  ;;  %2163 = vmatpush3.bf16.msra.mxu0 %v3774_v48 }
 0x379   :  { %1734 = vmatprep.subr.bf16.mxu1 %v3775_v8  ;;  %2164 = vmatprep.subr.bf16.mxu0 %v3684_v35 }
 0x37c   :  { %1735 = vmatpush1.bf16.msra.mxu1 %v3776_v58  ;;  %2165 = vmatpush3.bf16.msra.mxu0 %v3777_v27 }
 0x37d   :  { %1736 = vmatprep.subr.bf16.mxu1 %v3778_v0  ;;  %2166 = vmatprep.subr.bf16.mxu0 %v3684_v35 }
 0x380   :  { %1737 = vmatpush1.bf16.msra.mxu1 %v3779_v18  ;;  %2167 = vmatpush3.bf16.msra.mxu0 %v3780_v17 }
 0x383   :  { %1755 = vmatmul.mubr.bf16.vlgmr.msra.gmra.mrb[12].mxu1 %v3449_v61  ;;  %2169 = vmatmul.mubr.bf16.vlgmr.msra.gmra.mrb[16].mxu0 %v3449_v61 }
 0x436   :  { %v1715_v24 = vpop.f32.mrb[12].mxu0 }
 0x437   :  { %v2150_v2 = vpop.f32.mrb[13].mxu0 }
 0x438   :  { %v1718_v44 = vpop.f32.mrb[14].mxu0 }
 0x439   :  { %v2151_v19 = vpop.f32.mrb[15].mxu0 }
 0x456   :  { %v1756_v33 = vpop.f32.mrb[12].mxu1  ;;  %v1799_v20 = vpop.f32.mrb[16].mxu0 }
 0x457   :  { %v2181_v42 = vadd.f32 %v3781_v21, %v1756_v33  ;;  %v1800_v28 = vadd.f32 %v1799_v20, %v1715_v24  ;;  %v1758_v16 = vpop.f32.mrb[13].mxu1  ;;  %v2170_v3 = vpop.f32.mrb[17].mxu0 }
 0x458   :  { %v1760_v35 = vpop.f32.mrb[14].mxu1  ;;  %v1802_v30 = vpop.f32.mrb[18].mxu0  ;;  %v2183_v57 = vadd.f32 %v3782_v34, %v1758_v16 }
 0x459   :  { %v1994_v1 = vmul.f32 -1.442695, %v2181_v42  ;;  %v2185_v15 = vadd.f32 %v3781_v21, %v1760_v35  ;;  %v1803_v53 = vadd.f32 %v1802_v30, %v1718_v44  ;;  %v1762_v10 = vpop.f32.mrb[15].mxu1  ;;  %v2171_v36 = vpop.f32.mrb[19].mxu0  ;;  %v1808_v31 = vadd.f32 %v1800_v28, %v3786_v59 }
 0x45a   :  { %v2187_v41 = vadd.f32 %v3782_v34, %v1762_v10  ;;  %v1996_v22 = vmul.f32 -1.442695, %v2183_v57 }
 0x45b   :  { %2392 = vpow2.f32 %v1994_v1  ;;  %v1995_v61 = vmul.f32 -1.442695, %v2185_v15  ;;  %v1811_v4 = vadd.f32 %v1803_v53, %v3786_v59 }
 0x45c   :  { %v1997_v60 = vmul.f32 -1.442695, %v2187_v41 }
 0x45d   :  { %2394 = vpow2.f32 %v1995_v61 }
 0x45e   :  { %2396 = vpow2.f32 %v1996_v22 }
 0x465   :  { %v2393_v23 = vpop.eup %2392 }
 0x466   :  { %v1820_v14 = vadd.f32 1.0, %v2393_v23 }
 0x467   :  { %v2395_v51 = vpop.eup %2394 }
 0x468   :  { %2398 = vrcp.f32 %v1820_v14  ;;  %v1821_v26 = vadd.f32 1.0, %v2395_v51  ;;  %v2397_v12 = vpop.eup %2396 }
 0x469   :  { %2400 = vpow2.f32 %v1997_v60  ;;  %v1834_v55 = vadd.f32 1.0, %v2397_v12 }
 0x46a   :  { %2402 = vrcp.f32 %v1821_v26 }
 0x472   :  { %v2399_v5 = vpop.eup %2398 }
 0x473   :  { %v2401_v7 = vpop.eup %2400  ;;  %v1840_v43 = vmul.f32 %v2399_v5, %v1395_v40 }
 0x474   :  { %v2403_v45 = vpop.eup %2402  ;;  %v1835_v47 = vadd.f32 1.0, %v2401_v7 }
 0x475   :  { %v1842_v38 = vadd.f32 %v1840_v43, %v1808_v31  ;;  %v1841_v63 = vmul.f32 %v2403_v45, %v1399_v32 }
 0x477   :  { %2404 = vtanh.f32 %v1842_v38  ;;  %v1843_v11 = vadd.f32 %v1841_v63, %v1811_v4 }
 0x478   :  { %2406 = vrcp.f32 %v1834_v55 }
 0x479   :  { %2408 = vtanh.f32 %v1843_v11 }
 0x47a   :  { %2410 = vrcp.f32 %v1835_v47 }
 0x481   :  { %v2405_v37 = vpop.eup %2404 }
 0x482   :  { %v2407_v49 = vpop.eup %2406  ;;  %v1846_v54 = vsub.f32 %v3787_v50, %v2405_v37 }
 0x483   :  { %v2409_v56 = vpop.eup %2408 }
 0x484   :  { %v1847_v29 = vsub.f32 %v3788_v52, %v2409_v56  ;;  %v1848_v9 = vmul.f32 %v2407_v49, %v1846_v54  ;;  %v2411_v6 = vpop.eup %2410 }
 0x486   :  { %v1849_v62 = vmul.f32 %v2411_v6, %v1847_v29  ;;  %v1850_v46 = vadd.f32 %v2405_v37, %v1848_v9 }
 0x488   :  { %v1851_v48 = vadd.f32 %v2409_v56, %v1849_v62  ;;  %1852 = vst [vmem:[#allocation2] sm:$0xff] %v1850_v46 }
 0x48a   :  { %1853 = vst [vmem:[#allocation2 + $0x8] sm:$0xff] %v1851_v48 }
 0x48b   :  { %2446 = shalt.err (!%p2443_p4)
}
 0x48c   :  { %s2447_s28 = scalar_lea.hbm %s3550_s6, 256 }
 0x48d   :  { %p2448_p5 = scmp.ne.s32.totalorder %s3550_s6, %s2447_s28  ;;  %p2451_p6 = scmp.lt.u32.totalorder %s2447_s28, %s3550_s6 }
 0x48f   :  { %p2453_p7 = pnand %p2451_p6, %p2448_p5 }
 0x491   :  { %2456 = shalt.err (!%p2453_p7)
}
 0x492   :  { %s2478_s9 = smov 128   ;;  %s2479_s10 = smov 8  }
 0x493   :  { %1865 = dma.vmem_to_hbm [thread:$0]  %s1860_s24, 256, %s3550_s6, [#allocation3], %s2478_s9, %s2478_s9, %s2479_s10  }
 0x494   :  { %2457 = dma.done.wait [#allocation3], 256  }
 0x495   :  { %2458 = vsyncadd [#allocation3], 4294967040 }
 0x496   :  { %1869 = vsyncpa [#allocation3], 1 }

</bundles_post_ra>
